<compile_context>
chip_gen: v7x
topology: tpu7x:2x2x1
jax: 0.10.0
libtpu: 0.0.40
codegen_flags: <defaults>
</compile_context>

<pallas_src>
import functools
from typing import Optional

import jax
import jax.numpy as jnp
from jax.experimental import pallas as pl
from jax.experimental.pallas import tpu as pltpu


# --------------------------------------------------------------------------- #
# Helpers
# --------------------------------------------------------------------------- #
def _llama_hidden_dim(dim: int, hidden_dim: int, multiple_of: int,
                      ffn_dim_multiplier: Optional[float]) -> int:
    hidden_dim = int(2 * hidden_dim / 3)
    if ffn_dim_multiplier is not None:
        hidden_dim = int(ffn_dim_multiplier * hidden_dim)
    hidden_dim = multiple_of * ((hidden_dim + multiple_of - 1) // multiple_of)
    return hidden_dim


def _round_up(x: int, m: int) -> int:
    return ((x + m - 1) // m) * m


def _vmem_capacity_bytes() -> int:
    try:
        return int(pltpu.get_tpu_info().vmem_capacity_bytes)
    except Exception:
        return 64 * 1024 * 1024          # conservative (v7x per-TC) fallback


def _chip_generation() -> int:
    """Best-effort TPU generation (5 = v5e, 6 = v6e, 7 = v7x)."""
    try:
        kind = jax.devices()[0].device_kind.lower()
    except Exception:
        return 6
    for g in (7, 6, 5, 4, 3, 2):
        if f"v{g}" in kind:
            return g
    return 6


def _pick_tm(tokens: int, gen: int, tm: Optional[int]) -> int:
    """Token tile: big on v6e/v7x (weight-streaming roofline), 128/256 on v5e."""
    if tm is None:
        if gen <= 5:
            tm = 256 if (tokens >= 1024 and tokens % 256 == 0) else 128
        else:
            tm = 512
        # v7x has 2 TensorCores; the "parallel" token axis is what shards work
        # across them, so make sure there are at least 2 token tiles.
        if gen >= 7 and tokens >= 256:
            tm = min(tm, _round_up((tokens + 1) // 2, 128))
    tm = max(128, _round_up(tm, 128))
    tm = min(tm, _round_up(tokens, 128))
    return tm


def _pick_th(dim: int, hidden: int, compute_dtype, tm_max: int) -> int:
    """Hidden tile sized so double-buffered tiles + intermediates fit VMEM."""
    cap = _vmem_capacity_bytes()
    budget = int(cap * 0.85) - (2 << 20)            # headroom for bookkeeping
    wbytes = jnp.dtype(compute_dtype).itemsize
    obytes = 4                                       # worst-case f32 output
    tm = tm_max
    hidden_r = _round_up(hidden, 128)

    # Fixed VMEM: x tile + out tile, double-buffered each.
    fixed_base = 2 * tm * dim * wbytes + 2 * tm * dim * obytes
    # Per hidden column: double-buffered w1/w3/w2 columns plus the
    # compiler-materialized h1/h3 (f32) and gated (f32 + compute dtype)
    # intermediates (~14*tm bytes per column).
    per_col = 2 * 3 * dim * wbytes + 14 * tm

    # Weights-resident fast path (no accumulator scratch needed).
    if fixed_base + per_col * hidden_r <= budget:
        return hidden_r

    # Tiled path: also reserve the (tm, dim) f32 accumulator.
    avail = budget - (fixed_base + tm * dim * 4)
    max_th = max(128, (avail // per_col // 128) * 128)

    # Prefer a 256-aligned tile that evenly divides the hidden dim.
    best_div_256 = None
    best_div = None
    for cand in range(max_th, 127, -128):
        if hidden_r % cand == 0:
            if cand % 256 == 0 and best_div_256 is None:
                best_div_256 = cand
                break
            if best_div is None:
                best_div = cand
    if best_div_256 is not None:
        return best_div_256
    if best_div is not None and best_div >= max(256, max_th // 2):
        return best_div
    if max_th >= 256:
        return (max_th // 256) * 256
    return max_th


# --------------------------------------------------------------------------- #
# Kernels
# --------------------------------------------------------------------------- #
def _ffn_kernel_resident(x_ref, w1_ref, w3_ref, w2_ref, o_ref):
    # Whole hidden dim resident in VMEM: no accumulator, direct output write.
    h1 = jnp.dot(x_ref[...], w1_ref[...], preferred_element_type=jnp.float32)
    h3 = jnp.dot(x_ref[...], w3_ref[...], preferred_element_type=jnp.float32)
    gated = (h1 * jax.nn.sigmoid(h1)) * h3                    # silu(h1) * h3 (f32)
    o_ref[...] = jnp.dot(gated.astype(w2_ref.dtype), w2_ref[...],
                         preferred_element_type=jnp.float32).astype(o_ref.dtype)


def _ffn_kernel_tiled(x_ref, w1_ref, w3_ref, w2_ref, o_ref, acc_ref):
    # x_ref: (tm, dim)  w1_ref/w3_ref: (dim, th)  w2_ref: (th, dim)
    # acc_ref: (tm, dim) f32, resident across the hidden grid axis.
    j = pl.program_id(1)

    h1 = jnp.dot(x_ref[...], w1_ref[...], preferred_element_type=jnp.float32)
    h3 = jnp.dot(x_ref[...], w3_ref[...], preferred_element_type=jnp.float32)
    gated = (h1 * jax.nn.sigmoid(h1)) * h3
    part = jnp.dot(gated.astype(w2_ref.dtype), w2_ref[...],
                   preferred_element_type=jnp.float32)

    @pl.when(j == 0)
    def _first():
        acc_ref[...] = part          # write, don't zero-init + add

    @pl.when(j > 0)
    def _accum():
        acc_ref[...] += part

    @pl.when(j == pl.num_programs(1) - 1)
    def _finalize():
        o_ref[...] = acc_ref[...].astype(o_ref.dtype)


# --------------------------------------------------------------------------- #
# Weight packing (call once, reuse across calls)
# --------------------------------------------------------------------------- #
def pack_ffn_weights(w1, w3, w2, *, compute_dtype=jnp.bfloat16,
                     th: Optional[int] = None, tm_max: Optional[int] = None):
    """Pad the hidden dim to a multiple of the hidden tile and cast to the MXU
    compute dtype.  Call ONCE per weight set and reuse the result — this is the
    repack/cast work that must NOT sit in the per-call hot path.

    Returns (w1p, w3p, w2p, th) with w1p/w3p: [dim, hidden_p], w2p: [hidden_p, dim].
    """
    dim, hidden = w1.shape
    gen = _chip_generation()
    if tm_max is None:
        tm_max = 256 if gen <= 5 else 512
    if th is None:
        th = _pick_th(dim, hidden, compute_dtype, tm_max)
    th = min(_round_up(th, 128), _round_up(hidden, 128))
    hidden_p = _round_up(hidden, th)
    if hidden_p != hidden:
        ph = hidden_p - hidden
        # Zero padding is exact: silu(0) * 0 == 0 and padded w2 rows are zero.
        w1 = jnp.pad(w1, ((0, 0), (0, ph)))
        w3 = jnp.pad(w3, ((0, 0), (0, ph)))
        w2 = jnp.pad(w2, ((0, ph), (0, 0)))
    return (w1.astype(compute_dtype), w3.astype(compute_dtype),
            w2.astype(compute_dtype), th)


# --------------------------------------------------------------------------- #
# Apply (the hot path; weights already packed)
# --------------------------------------------------------------------------- #
@functools.partial(jax.jit, static_argnames=("th", "hidden", "tm"))
def ffn_apply(x, w1p, w3p, w2p, *, th: int, hidden: Optional[int] = None,
              tm: Optional[int] = None):
    """SwiGLU FFN on pre-packed weights.  x: [..., dim]."""
    orig_shape = x.shape
    dim = orig_shape[-1]
    hidden_p = w1p.shape[1]
    if hidden is None:
        hidden = hidden_p
    assert hidden_p % th == 0, "packed hidden dim must be a multiple of th"
    out_dtype = x.dtype
    compute_dtype = w1p.dtype

    x2d = x.reshape(-1, dim)
    tokens = x2d.shape[0]
    gen = _chip_generation()
    tm = _pick_tm(tokens, gen, tm)
    tokens_p = _round_up(tokens, tm)
    if tokens_p != tokens:
        x2d = jnp.pad(x2d, ((0, tokens_p - tokens), (0, 0)))
    x2d = x2d.astype(compute_dtype)

    n_tm = tokens_p // tm
    n_th = hidden_p // th

    witem = jnp.dtype(compute_dtype).itemsize
    oitem = jnp.dtype(out_dtype).itemsize
    weight_passes = n_tm if n_th > 1 else 1          # weights re-streamed per token tile
    cost = pl.CostEstimate(
        flops=6 * tokens * dim * hidden,
        transcendentals=tokens * hidden,
        bytes_accessed=int(tokens_p * dim * (witem + oitem)
                           + weight_passes * 3 * dim * hidden_p * witem),
    )
    vmem_limit = int(_vmem_capacity_bytes() * 0.9)

    if n_th == 1:
        # Weights-resident fast path: single grid axis, no accumulator scratch.
        out = pl.pallas_call(
            _ffn_kernel_resident,
            out_shape=jax.ShapeDtypeStruct((tokens_p, dim), out_dtype),
            grid_spec=pltpu.PrefetchScalarGridSpec(
                num_scalar_prefetch=0,
                grid=(n_tm,),
                in_specs=[
                    pl.BlockSpec((tm, dim), lambda i: (i, 0)),          # x tile
                    pl.BlockSpec((dim, hidden_p), lambda i: (0, 0)),    # w1 (resident)
                    pl.BlockSpec((dim, hidden_p), lambda i: (0, 0)),    # w3 (resident)
                    pl.BlockSpec((hidden_p, dim), lambda i: (0, 0)),    # w2 (resident)
                ],
                out_specs=pl.BlockSpec((tm, dim), lambda i: (i, 0)),
            ),
            compiler_params=pltpu.CompilerParams(
                dimension_semantics=("parallel",),
                vmem_limit_bytes=vmem_limit),
            cost_estimate=cost,
        )(x2d, w1p, w3p, w2p)
    else:
        out = pl.pallas_call(
            _ffn_kernel_tiled,
            out_shape=jax.ShapeDtypeStruct((tokens_p, dim), out_dtype),
            grid_spec=pltpu.PrefetchScalarGridSpec(
                num_scalar_prefetch=0,
                grid=(n_tm, n_th),
                in_specs=[
                    pl.BlockSpec((tm, dim), lambda i, j: (i, 0)),       # x tile
                    pl.BlockSpec((dim, th), lambda i, j: (0, j)),       # w1 tile
                    pl.BlockSpec((dim, th), lambda i, j: (0, j)),       # w3 tile
                    pl.BlockSpec((th, dim), lambda i, j: (j, 0)),       # w2 tile
                ],
                out_specs=pl.BlockSpec((tm, dim), lambda i, j: (i, 0)),
                scratch_shapes=[pltpu.VMEM((tm, dim), jnp.float32)],
            ),
            compiler_params=pltpu.CompilerParams(
                dimension_semantics=("parallel", "arbitrary"),
                vmem_limit_bytes=vmem_limit),
            cost_estimate=cost,
        )(x2d, w1p, w3p, w2p)

    if tokens_p != tokens:
        out = out[:tokens]
    return out.reshape(orig_shape)


def feed_forward(x, w1, w3, w2, *, compute_dtype=jnp.bfloat16,
                 tm: Optional[int] = None, th: Optional[int] = None):
    """One-shot convenience (packs weights every call).  For repeated calls,
    use pack_ffn_weights(...) once and ffn_apply(...) in the hot path."""
    w1p, w3p, w2p, th = pack_ffn_weights(w1, w3, w2, compute_dtype=compute_dtype,
                                         th=th)
    return ffn_apply(x, w1p, w3p, w2p, th=th, hidden=w1.shape[1], tm=tm)


def feed_forward_ref(x, w1, w3, w2):
    h1 = x @ w1
    h3 = x @ w3
    return (h1 * jax.nn.sigmoid(h1) * h3) @ w2


# --------------------------------------------------------------------------- #
# Self-test
# --------------------------------------------------------------------------- #
if __name__ == "__main__":
    # Module hyperparams (small, llama-style).
    dim = 128
    hidden = _llama_hidden_dim(dim, 4 * dim, multiple_of=128,
                               ffn_dim_multiplier=None)          # -> 384
    batch, seq = 2, 64

    key = jax.random.PRNGKey(0)
    kx, k1, k2, k3 = jax.random.split(key, 4)
    x = jax.random.normal(kx, (batch, seq, dim), dtype=jnp.float32)
    w1 = jax.random.normal(k1, (dim, hidden), dtype=jnp.float32) * 0.02
    w3 = jax.random.normal(k3, (dim, hidden), dtype=jnp.float32) * 0.02
    w2 = jax.random.normal(k2, (hidden, dim), dtype=jnp.float32) * 0.02

    ref = feed_forward_ref(x.reshape(-1, dim), w1, w3, w2).reshape(batch, seq, dim)

    # 1) Production path: pack once (hoisted out of the hot path), reuse.
    w1p, w3p, w2p, th_auto = pack_ffn_weights(w1, w3, w2)
    out_bf16 = jax.block_until_ready(
        ffn_apply(x, w1p, w3p, w2p, th=th_auto, hidden=hidden))
    assert out_bf16.shape == (batch, seq, dim)
    assert jnp.allclose(out_bf16, ref, atol=3e-3, rtol=3e-2), "bf16 path mismatch"
    # Second call reuses the packed weights — no per-call repack/cast.
    out_bf16_2 = jax.block_until_ready(
        ffn_apply(x, w1p, w3p, w2p, th=th_auto, hidden=hidden))
    assert jnp.allclose(out_bf16_2, out_bf16), "packed reuse mismatch"

    # 2) Full-precision compute path.
    out_f32 = jax.block_until_ready(
        feed_forward(x, w1, w3, w2, compute_dtype=jnp.float32))
    assert jnp.allclose(out_f32, ref, atol=1e-3, rtol=1e-2), "f32 path mismatch"

    # 3) Forced hidden tiling (th=128 -> grid (*, 3)): exercises the tiled
    #    kernel's first-write / accumulate / finalize path.
    out_tiled = jax.block_until_ready(feed_forward(x, w1, w3, w2, tm=128, th=128))
    assert jnp.allclose(out_tiled, ref, atol=3e-3, rtol=3e-2), "tiled path mismatch"

    print("KERNEL_OK")
</pallas_src>

<mosaic_0001>
module attributes {stable_mosaic.version = 11 : i64} {
  func.func @_ffn_kernel_resident(%arg0: i32, %arg1: memref<128x128xbf16, #tpu.memory_space<vmem>>, %arg2: memref<128x384xbf16, #tpu.memory_space<vmem>>, %arg3: memref<128x384xbf16, #tpu.memory_space<vmem>>, %arg4: memref<384x128xbf16, #tpu.memory_space<vmem>>, %arg5: memref<128x128xf32, #tpu.memory_space<vmem>>) attributes {dimension_semantics = [#tpu.dimension_semantics<parallel>], iteration_bounds = array<i64: 1>, scalar_prefetch = 0 : i64, scratch_operands = 0 : i64, tpu.core_type = #tpu.core_type<tc>, window_params = [{transform_indices = @transform_0, window_bounds = array<i64: 128, 128>}, {pipeline_mode = #tpu.pipeline_mode<synchronous>, transform_indices = @transform_1, window_bounds = array<i64: 128, 384>}, {pipeline_mode = #tpu.pipeline_mode<synchronous>, transform_indices = @transform_2, window_bounds = array<i64: 128, 384>}, {pipeline_mode = #tpu.pipeline_mode<synchronous>, transform_indices = @transform_3, window_bounds = array<i64: 384, 128>}, {transform_indices = @transform_4, window_bounds = array<i64: 128, 128>}]} {
    %c0 = arith.constant 0 : index
    %c0_0 = arith.constant 0 : index
    %0 = vector.load %arg1[%c0, %c0_0] : memref<128x128xbf16, #tpu.memory_space<vmem>>, vector<128x128xbf16>
    %c0_1 = arith.constant 0 : index
    %c0_2 = arith.constant 0 : index
    %1 = vector.load %arg2[%c0_1, %c0_2] : memref<128x384xbf16, #tpu.memory_space<vmem>>, vector<128x384xbf16>
    %cst = arith.constant dense<0.000000e+00> : vector<128x384xf32>
    %2 = tpu.matmul %0, %1, %cst {dimension_numbers = #tpu.dot_dimension_numbers<[1], [0], [0], [1], [0, 0, 1, 1], [], []>} : vector<128x128xbf16>, vector<128x384xbf16>, vector<128x384xf32> -> vector<128x384xf32>
    %c0_3 = arith.constant 0 : index
    %c0_4 = arith.constant 0 : index
    %3 = vector.load %arg1[%c0_3, %c0_4] : memref<128x128xbf16, #tpu.memory_space<vmem>>, vector<128x128xbf16>
    %c0_5 = arith.constant 0 : index
    %c0_6 = arith.constant 0 : index
    %4 = vector.load %arg3[%c0_5, %c0_6] : memref<128x384xbf16, #tpu.memory_space<vmem>>, vector<128x384xbf16>
    %cst_7 = arith.constant dense<0.000000e+00> : vector<128x384xf32>
    %5 = tpu.matmul %3, %4, %cst_7 {dimension_numbers = #tpu.dot_dimension_numbers<[1], [0], [0], [1], [0, 0, 1, 1], [], []>} : vector<128x128xbf16>, vector<128x384xbf16>, vector<128x384xf32> -> vector<128x384xf32>
    %6 = arith.negf %2 : vector<128x384xf32>
    %7 = math.exp %6 : vector<128x384xf32>
    %cst_8 = arith.constant 1.000000e+00 : f32
    %8 = vector.broadcast %cst_8 : f32 to vector<128x384xf32>
    %9 = arith.addf %8, %7 : vector<128x384xf32>
    %10 = arith.divf %8, %9 : vector<128x384xf32>
    %11 = arith.mulf %2, %10 : vector<128x384xf32>
    %12 = arith.mulf %11, %5 : vector<128x384xf32>
    %13 = arith.truncf %12 : vector<128x384xf32> to vector<128x384xbf16>
    %c0_9 = arith.constant 0 : index
    %c0_10 = arith.constant 0 : index
    %14 = vector.load %arg4[%c0_9, %c0_10] : memref<384x128xbf16, #tpu.memory_space<vmem>>, vector<384x128xbf16>
    %cst_11 = arith.constant dense<0.000000e+00> : vector<128x128xf32>
    %15 = tpu.matmul %13, %14, %cst_11 {dimension_numbers = #tpu.dot_dimension_numbers<[1], [0], [0], [1], [0, 0, 1, 1], [], []>} : vector<128x384xbf16>, vector<384x128xbf16>, vector<128x128xf32> -> vector<128x128xf32>
    %c0_12 = arith.constant 0 : index
    %c0_13 = arith.constant 0 : index
    %16 = vector.load %arg5[%c0_12, %c0_13] : memref<128x128xf32, #tpu.memory_space<vmem>>, vector<128x128xf32>
    tpu.vector_store %arg5[%c0_12, %c0_13], %15 {strides = array<i32>} : memref<128x128xf32, #tpu.memory_space<vmem>>, vector<128x128xf32>,
    return
  }
  func.func @transform_0(%arg0: i32) -> (i32, i32) {
    %c0_i32 = arith.constant 0 : i32
    %c0_i32_0 = arith.constant 0 : i32
    return %arg0, %c0_i32 : i32, i32
  }
  func.func @transform_1(%arg0: i32) -> (i32, i32) {
    %c0_i32 = arith.constant 0 : i32
    %c0_i32_0 = arith.constant 0 : i32
    %c0_i32_1 = arith.constant 0 : i32
    return %c0_i32, %c0_i32_0 : i32, i32
  }
  func.func @transform_2(%arg0: i32) -> (i32, i32) {
    %c0_i32 = arith.constant 0 : i32
    %c0_i32_0 = arith.constant 0 : i32
    %c0_i32_1 = arith.constant 0 : i32
    return %c0_i32, %c0_i32_0 : i32, i32
  }
  func.func @transform_3(%arg0: i32) -> (i32, i32) {
    %c0_i32 = arith.constant 0 : i32
    %c0_i32_0 = arith.constant 0 : i32
    %c0_i32_1 = arith.constant 0 : i32
    return %c0_i32, %c0_i32_0 : i32, i32
  }
  func.func @transform_4(%arg0: i32) -> (i32, i32) {
    %c0_i32 = arith.constant 0 : i32
    %c0_i32_0 = arith.constant 0 : i32
    return %arg0, %c0_i32 : i32, i32
  }
}

</mosaic_0001>

<bundles_post_ra>
// kernel: ffn_apply.1
= control target key start
LH: loop header
LB: loop body
LE: loop exit
PB: predicated region body
PF: predicated region fallthrough
CT: control target
= control target key end

     0   :  { %9 = vsyncpa [#allocation3], 0  ;;  %s2925_s0 = inlined_call_operand.vmem [shape: bf16[128,128], index: 0, kind: input, shape index: {}]   ;;  %s2926_s1 = inlined_call_operand.vmem [shape: bf16[128,384], index: 1, kind: input, shape index: {}]   ;;  %s2927_s2 = inlined_call_operand.hbm [shape: bf16[128,384], index: 2, kind: input, shape index: {}]   ;;  %s2928_s3 = inlined_call_operand.hbm [shape: bf16[384,128], index: 3, kind: input, shape index: {}]   ;;  %s2929_s4 = inlined_call_operand.hbm [shape: f32[128,128], index: 4, kind: output, shape index: {}]  }
   0x1   :  { %10 = vsyncpa [#allocation6], 0 }
   0x2   :  { %11 = vsyncpa [#allocation4], 0  ;;  %s2385_s15 = smov [#allocation2]   ;;  %s2313_s19 = scalar_lea.hbm %s2927_s2, 3072 }
   0x3   :  { %s21_s16 = sshll.u32 %s2385_s15, 4  ;;  %p2314_p0 = scmp.ne.s32.totalorder %s2927_s2, %s2313_s19  ;;  %s22_s16 = int_to_ptr.vmem [resolvable:$true] %s21_s16 }
   0x4   :  { %p2317_p1 = scmp.lt.u32.totalorder %s2313_s19, %s2927_s2 }
   0x6   :  { %p2319_p2 = pnand %p2317_p1, %p2314_p0 }
   0x8   :  { %2322 = shalt.err (!%p2319_p2)
}
   0x9   :  { %s2323_s24 = scalar_lea.vmem %s22_s16, 3072  ;;  %p2328_p4 = scmp.lt.s32.totalorder %s22_s16, %s22_s16 }
   0xa   :  { %p2324_p3 = scmp.ne.s32.totalorder %s22_s16, %s2323_s24  ;;  %p2329_p5 = scmp.lt.s32.totalorder %s2323_s24, %s2323_s24 }
   0xc   :  { %p2330_p6 = por %p2329_p5, %p2328_p4 }
   0xe   :  { %p2331_p7 = pnand %p2330_p6, %p2324_p3 }
  0x10   :  { %2334 = shalt.err (!%p2331_p7)
}
  0x11   :  { %s2386_s25 = smov 192   ;;  %s2387_s26 = smov 12  }
  0x12   :  { %27 = dma.hbm_to_vmem [thread:$0]  %s2927_s2, 3072, %s22_s16, [#allocation3], %s2386_s25, %s2386_s25, %s2387_s26  }
  0x13   :  { %s2388_s29 = smov [#allocation5]   ;;  %s2335_s7 = scalar_lea.hbm %s2928_s3, 3072 }
  0x14   :  { %s33_s30 = sshll.u32 %s2388_s29, 4  ;;  %p2336_p8 = scmp.ne.s32.totalorder %s2928_s3, %s2335_s7  ;;  %s34_s30 = int_to_ptr.vmem [resolvable:$true] %s33_s30 }
  0x15   :  { %p2339_p9 = scmp.lt.u32.totalorder %s2335_s7, %s2928_s3 }
  0x17   :  { %p2341_p10 = pnand %p2339_p9, %p2336_p8 }
  0x19   :  { %2344 = shalt.err (!%p2341_p10)
}
  0x1a   :  { %s2345_s12 = scalar_lea.vmem %s34_s30, 3072  ;;  %p2350_p12 = scmp.lt.s32.totalorder %s34_s30, %s34_s30 }
  0x1b   :  { %p2346_p11 = scmp.ne.s32.totalorder %s34_s30, %s2345_s12  ;;  %p2351_p13 = scmp.lt.s32.totalorder %s2345_s12, %s2345_s12 }
  0x1d   :  { %p2352_p0 = por %p2351_p13, %p2350_p12 }
  0x1f   :  { %p2353_p1 = pnand %p2352_p0, %p2346_p11 }
  0x21   :  { %2356 = shalt.err (!%p2353_p1)
}
  0x22   :  { %s2389_s2 = smov 64   ;;  %s2390_s13 = smov 4  }
  0x23   :  { %39 = dma.hbm_to_vmem [thread:$0]  %s2928_s3, 3072, %s34_s30, [#allocation6], %s2389_s2, %s2389_s2, %s2390_s13  }
  0x24   :  { %2379 = dma.done.wait [#allocation3], 3072  }
  0x25   :  { %2380 = vsyncadd [#allocation3], 4294964224 }
  0x26   :  { %2381 = dma.done.wait [#allocation6], 3072  }
  0x27   :  { %2382 = vsyncadd [#allocation6], 4294964224  ;;  %v2391_v0 = vmov 0   ;;  %v2025_v1 = vld [vmem:[%s2926_s1 + $0x4] ss:$12 sps:$4 sm:$0xff]   ;;  %v2526_v28 = vld [vmem:[%s2925_s0 + $0x8] sm:$0xff]  }
  0x28   :  { %303 = vmatprep.mubr.bf16.mxu0 %v2391_v0  ;;  %v2027_v2 = vld [vmem:[%s2926_s1 + $0x8] ss:$12 sps:$4 sm:$0xff]   ;;  %271 = vmatprep.subr.bf16.mxu0 %v2025_v1  ;;  %v2028_v3 = vld [vmem:[%s2926_s1] ss:$12 sps:$4 sm:$0xff]   ;;  %v2032_v6 = vld [vmem:[%s2926_s1 + $0x18] ss:$12 sps:$4 sm:$0xff]  }
  0x29   :  { %1919 = vmatprep.subr.bf16.mxu1 %v2027_v2  ;;  %v2029_v4 = vld [vmem:[%s2926_s1 + $0x1c] ss:$12 sps:$4 sm:$0xff]   ;;  %272 = vmatpush1.bf16.msra.mxu0 %v2028_v3  ;;  %v2031_v5 = vld [vmem:[%s2926_s1 + $0x20] ss:$12 sps:$4 sm:$0xff]   ;;  %v2035_v8 = vld [vmem:[%s2926_s1 + $0x38] ss:$12 sps:$4 sm:$0xff]  }
  0x2a   :  { %1920 = vmatpush3.bf16.msra.mxu1 %v2027_v2  ;;  %273 = vmatprep.subr.bf16.mxu0 %v2029_v4  ;;  %v2033_v7 = vld [vmem:[%s2926_s1 + $0x34] ss:$12 sps:$4 sm:$0xff]   ;;  %v2036_v9 = vld [vmem:[%s2926_s1 + $0x30] ss:$12 sps:$4 sm:$0xff]   ;;  %v2037_v10 = vld [vmem:[%s2926_s1 + $0x4c] ss:$12 sps:$4 sm:$0xff]  }
  0x2b   :  { %1921 = vmatprep.subr.bf16.mxu1 %v2031_v5  ;;  %v2039_v11 = vld [vmem:[%s2926_s1 + $0x50] ss:$12 sps:$4 sm:$0xff]   ;;  %v2040_v12 = vld [vmem:[%s2926_s1 + $0x48] ss:$12 sps:$4 sm:$0xff]   ;;  %v2044_v15 = vld [vmem:[%s2926_s1 + $0x60] ss:$12 sps:$4 sm:$0xff]  }
  0x2c   :  { %v2041_v13 = vld [vmem:[%s2926_s1 + $0x64] ss:$12 sps:$4 sm:$0xff]   ;;  %v2043_v14 = vld [vmem:[%s2926_s1 + $0x68] ss:$12 sps:$4 sm:$0xff]   ;;  %v2047_v17 = vld [vmem:[%s2926_s1 + $0x80] ss:$12 sps:$4 sm:$0xff]  }
  0x2d   :  { %274 = vmatpush1.bf16.msra.mxu0 %v2032_v6  ;;  %v2045_v16 = vld [vmem:[%s2926_s1 + $0x7c] ss:$12 sps:$4 sm:$0xff]   ;;  %v2499_v18 = vld [vmem:[%s2925_s0] sm:$0xff]   ;;  %v2053_v23 = vld [vmem:[%s2926_s1 + $0xac] ss:$12 sps:$4 sm:$0xff]  }
  0x2e   :  { %1922 = vmatpush3.bf16.msra.mxu1 %v2031_v5  ;;  %275 = vmatprep.subr.bf16.mxu0 %v2033_v7  ;;  %v2048_v19 = vld [vmem:[%s2926_s1 + $0x78] ss:$12 sps:$4 sm:$0xff]   ;;  %v2049_v20 = vld [vmem:[%s2926_s1 + $0x94] ss:$12 sps:$4 sm:$0xff]   ;;  %v2052_v22 = vld [vmem:[%s2926_s1 + $0x90] ss:$12 sps:$4 sm:$0xff]  }
  0x2f   :  { %1923 = vmatprep.subr.bf16.mxu1 %v2035_v8  ;;  %v2051_v21 = vld [vmem:[%s2926_s1 + $0x98] ss:$12 sps:$4 sm:$0xff]   ;;  %1935 = vmatprep.mubr.bf16.mxu1 %v2499_v18  ;;  %v2055_v24 = vld [vmem:[%s2926_s1 + $0xb0] ss:$12 sps:$4 sm:$0xff]   ;;  %v2056_v25 = vld [vmem:[%s2926_s1 + $0xa8] ss:$12 sps:$4 sm:$0xff]  }
  0x30   :  { %v2061_v26 = vld [vmem:[#allocation2 + $0x4] ss:$12 sps:$4 sm:$0xff]   ;;  %v2062_v27 = vld [vmem:[#allocation2 + $0x8] ss:$12 sps:$4 sm:$0xff]   ;;  %v2059_v29 = vld [vmem:[#allocation2] ss:$12 sps:$4 sm:$0xff]  }
  0x31   :  { %276 = vmatpush1.bf16.msra.mxu0 %v2036_v9  ;;  %v2065_v30 = vld [vmem:[#allocation2 + $0x1c] ss:$12 sps:$4 sm:$0xff]   ;;  %v2531_v31 = vld [vmem:[%s2925_s0 + $0x10] sm:$0xff]   ;;  %v2071_v32 = vld [vmem:[#allocation2 + $0x20] ss:$12 sps:$4 sm:$0xff]  }
  0x32   :  { %1924 = vmatpush3.bf16.msra.mxu1 %v2035_v8  ;;  %277 = vmatprep.subr.bf16.mxu0 %v2037_v10  ;;  %v2063_v33 = vld [vmem:[#allocation2 + $0x18] ss:$12 sps:$4 sm:$0xff]   ;;  %v2070_v34 = vld [vmem:[#allocation2 + $0x34] ss:$12 sps:$4 sm:$0xff]   ;;  %v2068_v37 = vld [vmem:[#allocation2 + $0x30] ss:$12 sps:$4 sm:$0xff]  }
  0x33   :  { %1925 = vmatprep.subr.bf16.mxu1 %v2039_v11  ;;  %v2080_v35 = vld [vmem:[#allocation2 + $0x38] ss:$12 sps:$4 sm:$0xff]   ;;  %v2089_v40 = vld [vmem:[#allocation2 + $0x50] ss:$12 sps:$4 sm:$0xff]   ;;  %v2072_v41 = vld [vmem:[#allocation2 + $0x48] ss:$12 sps:$4 sm:$0xff]  }
  0x34   :  { %v2540_v36 = vld [vmem:[%s2925_s0 + $0x18] sm:$0xff]   ;;  %v2545_v39 = vld [vmem:[%s2925_s0 + $0x20] sm:$0xff]   ;;  %v2554_v42 = vld [vmem:[%s2925_s0 + $0x28] sm:$0xff]  }
  0x35   :  { %278 = vmatpush1.bf16.msra.mxu0 %v2040_v12  ;;  %v2074_v38 = vld [vmem:[#allocation2 + $0x4c] ss:$12 sps:$4 sm:$0xff]   ;;  %v2079_v43 = vld [vmem:[#allocation2 + $0x64] ss:$12 sps:$4 sm:$0xff]   ;;  %v2083_v45 = vld [vmem:[#allocation2 + $0x7c] ss:$12 sps:$4 sm:$0xff]  }
  0x36   :  { %1926 = vmatpush3.bf16.msra.mxu1 %v2039_v11  ;;  %279 = vmatprep.subr.bf16.mxu0 %v2041_v13  ;;  %v2077_v44 = vld [vmem:[#allocation2 + $0x60] ss:$12 sps:$4 sm:$0xff]   ;;  %v2559_v46 = vld [vmem:[%s2925_s0 + $0x30] sm:$0xff]   ;;  %v2081_v48 = vld [vmem:[#allocation2 + $0x78] ss:$12 sps:$4 sm:$0xff]  }
  0x37   :  { %1927 = vmatprep.subr.bf16.mxu1 %v2043_v14  ;;  %v2093_v47 = vld [vmem:[#allocation2 + $0x68] ss:$12 sps:$4 sm:$0xff]   ;;  %v2094_v49 = vld [vmem:[#allocation2 + $0x80] ss:$12 sps:$4 sm:$0xff]   ;;  %v2085_v51 = vld [vmem:[%s2925_s0 + $0x38] sm:$0xff]   ;;  %s2392_s0 = smov [#allocation7]  }
  0x38   :  { %v2088_v50 = vld [vmem:[#allocation2 + $0x94] ss:$12 sps:$4 sm:$0xff]   ;;  %v2086_v52 = vld [vmem:[#allocation2 + $0x90] ss:$12 sps:$4 sm:$0xff]   ;;  %v2092_v53 = vld [vmem:[#allocation2 + $0xac] ss:$12 sps:$4 sm:$0xff]  }
  0x39   :  { %280 = vmatpush1.bf16.msra.mxu0 %v2044_v15  ;;  %v2095_v54 = vld [vmem:[#allocation2 + $0x98] ss:$12 sps:$4 sm:$0xff]   ;;  %v2090_v55 = vld [vmem:[#allocation2 + $0xa8] ss:$12 sps:$4 sm:$0xff]   ;;  %v2096_v56 = vld [vmem:[#allocation2 + $0xb0] ss:$12 sps:$4 sm:$0xff]  }
  0x3a   :  { %1928 = vmatpush3.bf16.msra.mxu1 %v2043_v14  ;;  %281 = vmatprep.subr.bf16.mxu0 %v2045_v16  ;;  %v2097_v57 = vld [vmem:[#allocation5 + $0x40] sm:$0xff]   ;;  %v2100_v59 = vld [vmem:[#allocation5 + $0x48] sm:$0xff]   ;;  %v2102_v61 = vld [vmem:[#allocation5 + $0x50] sm:$0xff]   ;;  %s1666_s22 = sshll.u32 %s2392_s0, 4  ;;  %s1667_s22 = int_to_ptr.vmem [resolvable:$true] %s1666_s22 }
  0x3b   :  { %1929 = vmatprep.subr.bf16.mxu1 %v2047_v17  ;;  %v2098_v58 = vld [vmem:[#allocation5] sm:$0xff]   ;;  %v2101_v60 = vld [vmem:[#allocation5 + $0x8] sm:$0xff]   ;;  %v2103_v62 = vld [vmem:[#allocation5 + $0x10] sm:$0xff]   ;;  %s2357_s23 = scalar_lea.vmem %s1667_s22, 2048  ;;  %p2362_p3 = scmp.lt.s32.totalorder %s1667_s22, %s1667_s22 }
  0x3c   :  { %v2105_v63 = vld [vmem:[#allocation5 + $0x58] sm:$0xff]   ;;  %v2108_v2 = vld [vmem:[#allocation5 + $0x20] sm:$0xff]   ;;  %v2110_v4 = vld [vmem:[#allocation5 + $0x68] sm:$0xff]   ;;  %p2358_p2 = scmp.ne.s32.totalorder %s1667_s22, %s2357_s23  ;;  %p2363_p4 = scmp.lt.s32.totalorder %s2357_s23, %s2357_s23 }
  0x3d   :  { %282 = vmatpush1.bf16.msra.mxu0 %v2048_v19  ;;  %v2106_v1 = vld [vmem:[#allocation5 + $0x18] sm:$0xff]   ;;  %v2099_v3 = vld [vmem:[#allocation5 + $0x80] sm:$0xff]   ;;  %v2111_v5 = vld [vmem:[#allocation5 + $0x28] sm:$0xff]  }
  0x3e   :  { %1930 = vmatpush3.bf16.msra.mxu1 %v2047_v17  ;;  %283 = vmatprep.subr.bf16.mxu0 %v2049_v20  ;;  %v2104_v6 = vld [vmem:[#allocation5 + $0x88] sm:$0xff]   ;;  %v2112_v7 = vld [vmem:[#allocation5 + $0x70] sm:$0xff]   ;;  %v2115_v9 = vld [vmem:[#allocation5 + $0x78] sm:$0xff]   ;;  %p2364_p5 = por %p2363_p4, %p2362_p3 }
  0x3f   :  { %1931 = vmatprep.subr.bf16.mxu1 %v2051_v21  ;;  %v2113_v8 = vld [vmem:[#allocation5 + $0x30] sm:$0xff]   ;;  %v2116_v10 = vld [vmem:[#allocation5 + $0x38] sm:$0xff]   ;;  %v2117_v13 = vld [vmem:[#allocation5 + $0xa0] sm:$0xff]  }
  0x40   :  { %v2109_v11 = vld [vmem:[#allocation5 + $0x90] sm:$0xff]   ;;  %v2114_v12 = vld [vmem:[#allocation5 + $0x98] sm:$0xff]   ;;  %v2118_v14 = vld [vmem:[#allocation5 + $0xa8] sm:$0xff]   ;;  %p2365_p6 = pnand %p2364_p5, %p2358_p2 }
  0x41   :  { %284 = vmatpush1.bf16.msra.mxu0 %v2052_v22  ;;  %v2119_v15 = vld [vmem:[#allocation5 + $0xb0] sm:$0xff]   ;;  %v2120_v16 = vld [vmem:[#allocation5 + $0xb8] sm:$0xff]  }
  0x42   :  { %1932 = vmatpush3.bf16.msra.mxu1 %v2051_v21  ;;  %285 = vmatprep.subr.bf16.mxu0 %v2053_v23 }
  0x43   :  { %1933 = vmatprep.subr.bf16.mxu1 %v2055_v24 }
  0x45   :  { %286 = vmatpush1.bf16.msra.mxu0 %v2056_v25 }
  0x46   :  { %1934 = vmatpush3.bf16.msra.mxu1 %v2055_v24  ;;  %1951 = vmatprep.subr.bf16.mxu0 %v2062_v27 }
  0x47   :  { %641 = vmatprep.subr.bf16.mxu1 %v2061_v26 }
  0x48   :  { %304 = vmatmul.mubr.bf16.vlgmr.msra.gmra.mrb[0].mxu0 %v2499_v18 }
  0x49   :  { %1936 = vmatmul.mubr.bf16.vlgmr.msra.gmra.mrb[0].mxu1 %v2526_v28  ;;  %1952 = vmatpush3.bf16.msra.mxu0 %v2062_v27 }
  0x4a   :  { %642 = vmatpush1.bf16.msra.mxu1 %v2059_v29  ;;  %313 = vmatprep.mubr.bf16.mxu0 %v2391_v0 }
  0x4b   :  { %643 = vmatprep.subr.bf16.mxu1 %v2065_v30  ;;  %1939 = vmatprep.mubr.bf16.mxu1 %v2531_v31 }
  0x4c   :  { %1953 = vmatprep.subr.bf16.mxu0 %v2071_v32 }
  0x4d   :  { %1954 = vmatpush3.bf16.msra.mxu0 %v2071_v32 }
  0x4e   :  { %644 = vmatpush1.bf16.msra.mxu1 %v2063_v33  ;;  %1955 = vmatprep.subr.bf16.mxu0 %v2080_v35 }
  0x4f   :  { %645 = vmatprep.subr.bf16.mxu1 %v2070_v34 }
  0x50   :  { %314 = vmatmul.mubr.bf16.gmra.mrb[4].mxu0 %v2526_v28 }
  0x51   :  { %1940 = vmatmul.mubr.bf16.gmra.mrb[4].mxu1 %v2540_v36  ;;  %323 = vmatprep.mubr.bf16.mxu0 %v2391_v0 }
  0x52   :  { %646 = vmatpush1.bf16.msra.mxu1 %v2068_v37  ;;  %1943 = vmatprep.mubr.bf16.mxu1 %v2545_v39 }
  0x53   :  { %647 = vmatprep.subr.bf16.mxu1 %v2074_v38  ;;  %1956 = vmatpush3.bf16.msra.mxu0 %v2080_v35 }
  0x54   :  { %1957 = vmatprep.subr.bf16.mxu0 %v2089_v40 }
  0x56   :  { %648 = vmatpush1.bf16.msra.mxu1 %v2072_v41 }
  0x57   :  { %649 = vmatprep.subr.bf16.mxu1 %v2079_v43  ;;  %1958 = vmatpush3.bf16.msra.mxu0 %v2089_v40 }
  0x58   :  { %324 = vmatmul.mubr.bf16.gmra.mrb[8].mxu0 %v2531_v31  ;;  %1959 = vmatprep.subr.bf16.mxu0 %v2093_v47 }
  0x59   :  { %1944 = vmatmul.mubr.bf16.gmra.mrb[8].mxu1 %v2554_v42  ;;  %333 = vmatprep.mubr.bf16.mxu0 %v2391_v0 }
  0x5a   :  { %650 = vmatpush1.bf16.msra.mxu1 %v2077_v44  ;;  %1947 = vmatprep.mubr.bf16.mxu1 %v2559_v46 }
  0x5b   :  { %651 = vmatprep.subr.bf16.mxu1 %v2083_v45  ;;  %1960 = vmatpush3.bf16.msra.mxu0 %v2093_v47 }
  0x5c   :  { %1961 = vmatprep.subr.bf16.mxu0 %v2094_v49 }
  0x5e   :  { %652 = vmatpush1.bf16.msra.mxu1 %v2081_v48 }
  0x5f   :  { %653 = vmatprep.subr.bf16.mxu1 %v2088_v50  ;;  %1962 = vmatpush3.bf16.msra.mxu0 %v2094_v49 }
  0x60   :  { %334 = vmatmul.mubr.bf16.gmra.mrb[12].mxu0 %v2540_v36  ;;  %1963 = vmatprep.subr.bf16.mxu0 %v2095_v54 }
  0x61   :  { %1948 = vmatmul.mubr.bf16.gmra.mrb[12].mxu1 %v2085_v51  ;;  %343 = vmatprep.mubr.bf16.mxu0 %v2391_v0 }
  0x62   :  { %654 = vmatpush1.bf16.msra.mxu1 %v2086_v52  ;;  %673 = vmatprep.mubr.bf16.mxu1 %v2391_v0 }
  0x63   :  { %655 = vmatprep.subr.bf16.mxu1 %v2092_v53  ;;  %1964 = vmatpush3.bf16.msra.mxu0 %v2095_v54 }
  0x64   :  { %1965 = vmatprep.subr.bf16.mxu0 %v2096_v56 }
  0x66   :  { %656 = vmatpush1.bf16.msra.mxu1 %v2090_v55 }
  0x67   :  { %1966 = vmatpush3.bf16.msra.mxu0 %v2096_v56  ;;  %1983 = vmatprep.subr.bf16.mxu1 %v2099_v3 }
  0x68   :  { %344 = vmatmul.mubr.bf16.gmra.mrb[16].mxu0 %v2545_v39  ;;  %1839 = vmatprep.subr.bf16.mxu0 %v2097_v57 }
  0x69   :  { %674 = vmatmul.mubr.bf16.vlgmr.msra.gmra.mrb[16].mxu1 %v2499_v18  ;;  %353 = vmatprep.mubr.bf16.mxu0 %v2391_v0 }
  0x6a   :  { %683 = vmatprep.mubr.bf16.mxu1 %v2391_v0  ;;  %1984 = vmatpush3.bf16.msra.mxu1 %v2099_v3 }
  0x6b   :  { %1985 = vmatprep.subr.bf16.mxu1 %v2104_v6 }
  0x6e   :  { %1986 = vmatpush3.bf16.msra.mxu1 %v2104_v6 }
  0x6f   :  { %1987 = vmatprep.subr.bf16.mxu1 %v2109_v11 }
  0x70   :  { %354 = vmatmul.mubr.bf16.gmra.mrb[20].mxu0 %v2554_v42 }
  0x71   :  { %684 = vmatmul.mubr.bf16.gmra.mrb[20].mxu1 %v2526_v28  ;;  %363 = vmatprep.mubr.bf16.mxu0 %v2391_v0 }
  0x72   :  { %693 = vmatprep.mubr.bf16.mxu1 %v2391_v0  ;;  %1988 = vmatpush3.bf16.msra.mxu1 %v2109_v11 }
  0x73   :  { %1989 = vmatprep.subr.bf16.mxu1 %v2114_v12 }
  0x76   :  { %1990 = vmatpush3.bf16.msra.mxu1 %v2114_v12 }
  0x77   :  { %1991 = vmatprep.subr.bf16.mxu1 %v2117_v13 }
  0x78   :  { %364 = vmatmul.mubr.bf16.gmra.mrb[24].mxu0 %v2559_v46 }
  0x79   :  { %694 = vmatmul.mubr.bf16.gmra.mrb[24].mxu1 %v2531_v31  ;;  %373 = vmatprep.mubr.bf16.mxu0 %v2391_v0 }
  0x7a   :  { %703 = vmatprep.mubr.bf16.mxu1 %v2391_v0  ;;  %1992 = vmatpush3.bf16.msra.mxu1 %v2117_v13 }
  0x7b   :  { %1993 = vmatprep.subr.bf16.mxu1 %v2118_v14 }
  0x7e   :  { %1994 = vmatpush3.bf16.msra.mxu1 %v2118_v14 }
  0x7f   :  { %1995 = vmatprep.subr.bf16.mxu1 %v2119_v15 }
  0x80   :  { %374 = vmatmul.mubr.bf16.gmra.mrb[28].mxu0 %v2085_v51 }
  0x81   :  { %704 = vmatmul.mubr.bf16.gmra.mrb[28].mxu1 %v2540_v36  ;;  %1967 = vmatprep.mubr.bf16.mxu0 %v2499_v18 }
  0x82   :  { %713 = vmatprep.mubr.bf16.mxu1 %v2391_v0  ;;  %1996 = vmatpush3.bf16.msra.mxu1 %v2119_v15 }
  0x83   :  { %1997 = vmatprep.subr.bf16.mxu1 %v2120_v16 }
  0x86   :  { %1998 = vmatpush3.bf16.msra.mxu1 %v2120_v16 }
  0x88   :  { %1968 = vmatmul.mubr.bf16.vlgmr.msra.gmra.mrb[32].mxu0 %v2526_v28 }
  0x89   :  { %714 = vmatmul.mubr.bf16.gmra.mrb[32].mxu1 %v2545_v39  ;;  %1971 = vmatprep.mubr.bf16.mxu0 %v2531_v31 }
  0x8a   :  { %723 = vmatprep.mubr.bf16.mxu1 %v2391_v0  ;;  %1840 = vmatpush3.bf16.msra.mxu0 %v2098_v58 }
  0x8b   :  { %1841 = vmatprep.subr.bf16.mxu0 %v2100_v59 }
  0x8e   :  { %1842 = vmatpush3.bf16.msra.mxu0 %v2101_v60 }
  0x8f   :  { %1843 = vmatprep.subr.bf16.mxu0 %v2102_v61 }
  0x90   :  { %1972 = vmatmul.mubr.bf16.gmra.mrb[36].mxu0 %v2540_v36 }
  0x91   :  { %724 = vmatmul.mubr.bf16.gmra.mrb[36].mxu1 %v2554_v42  ;;  %1975 = vmatprep.mubr.bf16.mxu0 %v2545_v39 }
  0x92   :  { %733 = vmatprep.mubr.bf16.mxu1 %v2391_v0  ;;  %1844 = vmatpush3.bf16.msra.mxu0 %v2103_v62 }
  0x93   :  { %1845 = vmatprep.subr.bf16.mxu0 %v2105_v63 }
  0x96   :  { %1846 = vmatpush3.bf16.msra.mxu0 %v2106_v1 }
  0x98   :  { %1976 = vmatmul.mubr.bf16.gmra.mrb[40].mxu0 %v2554_v42 }
  0x99   :  { %734 = vmatmul.mubr.bf16.gmra.mrb[40].mxu1 %v2559_v46  ;;  %1979 = vmatprep.mubr.bf16.mxu0 %v2559_v46 }
  0x9a   :  { %743 = vmatprep.mubr.bf16.mxu1 %v2391_v0  ;;  %v2107_v0 = vld [vmem:[#allocation5 + $0x60] sm:$0xff]  }
  0x9b   :  { %1847 = vmatprep.subr.bf16.mxu0 %v2107_v0 }
  0x9c   :  { %1848 = vmatpush3.bf16.msra.mxu0 %v2108_v2 }
  0x9d   :  { %1849 = vmatprep.subr.bf16.mxu0 %v2110_v4 }
  0xa0   :  { %1980 = vmatmul.mubr.bf16.gmra.mrb[44].mxu0 %v2085_v51 }
  0xa1   :  { %744 = vmatmul.mubr.bf16.gmra.mrb[44].mxu1 %v2085_v51  ;;  %1850 = vmatpush3.bf16.msra.mxu0 %v2111_v5 }
  0xa2   :  { %1851 = vmatprep.subr.bf16.mxu0 %v2112_v7 }
  0xa5   :  { %1852 = vmatpush3.bf16.msra.mxu0 %v2113_v8 }
  0xa6   :  { %1853 = vmatprep.subr.bf16.mxu0 %v2115_v9 }
  0xa9   :  { %1854 = vmatpush3.bf16.msra.mxu0 %v2116_v10 }
 0x11b   :  { %v2598_v17 = vpop.f32.mrb[0].mxu0 }
 0x11c   :  { %v2600_v18 = vpop.f32.mrb[0].mxu1  ;;  %v1735_v19 = vmul.f32 -1.442695, %v2598_v17  ;;  %v2604_v21 = vpop.f32.mrb[1].mxu0 }
 0x11d   :  { %v1743_v20 = vmul.f32 -1.442695, %v2600_v18  ;;  %v2606_v22 = vpop.f32.mrb[1].mxu1  ;;  %v1736_v23 = vmul.f32 -1.442695, %v2604_v21  ;;  %v2610_v25 = vpop.f32.mrb[2].mxu0 }
 0x11e   :  { %v1737_v24 = vmul.f32 -1.442695, %v2606_v22  ;;  %v2612_v26 = vpop.f32.mrb[2].mxu1  ;;  %2121 = vpow2.f32 %v1735_v19  ;;  %v1738_v27 = vmul.f32 -1.442695, %v2610_v25  ;;  %v2615_v28 = vpop.f32.mrb[3].mxu0 }
 0x11f   :  { %v2617_v29 = vpop.f32.mrb[3].mxu1  ;;  %2123 = vpow2.f32 %v1743_v20  ;;  %v1746_v30 = vmul.f32 -1.442695, %v2612_v26  ;;  %v1739_v31 = vmul.f32 -1.442695, %v2615_v28 }
 0x120   :  { %2125 = vpow2.f32 %v1736_v23  ;;  %v1740_v32 = vmul.f32 -1.442695, %v2617_v29 }
 0x121   :  { %2127 = vpow2.f32 %v1737_v24 }
 0x122   :  { %2129 = vpow2.f32 %v1738_v27 }
 0x123   :  { %2131 = vpow2.f32 %v1746_v30  ;;  %v2622_v33 = vpop.f32.mrb[4].mxu0 }
 0x124   :  { %v2624_v34 = vpop.f32.mrb[4].mxu1  ;;  %2133 = vpow2.f32 %v1739_v31  ;;  %v1741_v35 = vmul.f32 -1.442695, %v2622_v33  ;;  %v2628_v37 = vpop.f32.mrb[5].mxu0 }
 0x125   :  { %v1755_v36 = vmul.f32 -1.442695, %v2624_v34  ;;  %v2630_v38 = vpop.f32.mrb[5].mxu1  ;;  %2135 = vpow2.f32 %v1740_v32  ;;  %v1742_v39 = vmul.f32 -1.442695, %v2628_v37  ;;  %v2634_v41 = vpop.f32.mrb[6].mxu0 }
 0x126   :  { %v1749_v40 = vmul.f32 -1.442695, %v2630_v38  ;;  %v2636_v42 = vpop.f32.mrb[6].mxu1  ;;  %2137 = vpow2.f32 %v1741_v35  ;;  %v1744_v43 = vmul.f32 -1.442695, %v2634_v41  ;;  %v2639_v44 = vpop.f32.mrb[7].mxu0 }
 0x127   :  { %v2641_v45 = vpop.f32.mrb[7].mxu1  ;;  %2139 = vpow2.f32 %v1755_v36  ;;  %v1758_v19 = vmul.f32 -1.442695, %v2636_v42  ;;  %v1745_v27 = vmul.f32 -1.442695, %v2639_v44 }
 0x128   :  { %v2122_v46 = vpop.eup %2121  ;;  %2141 = vpow2.f32 %v1742_v39  ;;  %v1752_v35 = vmul.f32 -1.442695, %v2641_v45 }
 0x129   :  { %v2124_v47 = vpop.eup %2123  ;;  %v995_v48 = vadd.f32 1.0, %v2122_v46  ;;  %2143 = vpow2.f32 %v1749_v40 }
 0x12a   :  { %v2126_v49 = vpop.eup %2125  ;;  %v1003_v50 = vadd.f32 1.0, %v2124_v47  ;;  %2145 = vpow2.f32 %v1744_v43 }
 0x12b   :  { %v2128_v51 = vpop.eup %2127  ;;  %2147 = vrcp.f32 %v995_v48  ;;  %v996_v52 = vadd.f32 1.0, %v2126_v49  ;;  %v2643_v53 = vpop.f32.mrb[8].mxu0 }
 0x12c   :  { %v2645_v54 = vpop.f32.mrb[8].mxu1  ;;  %v2130_v55 = vpop.eup %2129  ;;  %2149 = vrcp.f32 %v1003_v50  ;;  %v997_v56 = vadd.f32 1.0, %v2128_v51  ;;  %v1747_v43 = vmul.f32 -1.442695, %v2643_v53 }
 0x12d   :  { %v2647_v57 = vpop.f32.mrb[9].mxu0  ;;  %v2132_v58 = vpop.eup %2131  ;;  %2151 = vrcp.f32 %v996_v52  ;;  %v998_v59 = vadd.f32 1.0, %v2130_v55  ;;  %v1767_v48 = vmul.f32 -1.442695, %v2645_v54 }
 0x12e   :  { %v2649_v60 = vpop.f32.mrb[9].mxu1  ;;  %v2651_v61 = vpop.f32.mrb[10].mxu0  ;;  %2153 = vrcp.f32 %v997_v56  ;;  %v1006_v63 = vadd.f32 1.0, %v2132_v58  ;;  %v1748_v50 = vmul.f32 -1.442695, %v2647_v57 }
 0x12f   :  { %v2134_v62 = vpop.eup %2133  ;;  %v2653_v1 = vpop.f32.mrb[10].mxu1  ;;  %2155 = vrcp.f32 %v998_v59  ;;  %v1761_v55 = vmul.f32 -1.442695, %v2649_v60  ;;  %v1750_v59 = vmul.f32 -1.442695, %v2651_v61 }
 0x130   :  { %2940 = vst [vmem:[#allocation11_spill] sm:$0xff] %v2653_v1  ;;  %v2136_v0 = vpop.eup %2135  ;;  %v999_v2 = vadd.f32 1.0, %v2134_v62  ;;  %v2655_v3 = vpop.f32.mrb[11].mxu0  ;;  %2157 = vrcp.f32 %v1006_v63 }
 0x131   :  { %v2657_v4 = vpop.f32.mrb[11].mxu1  ;;  %v2138_v5 = vpop.eup %2137  ;;  %v1000_v6 = vadd.f32 1.0, %v2136_v0 }
 0x132   :  { %2941 = vst [vmem:[#allocation12_spill] sm:$0xff] %v2657_v4  ;;  %v2140_v7 = vpop.eup %2139  ;;  %2159 = vrcp.f32 %v999_v2  ;;  %v1001_v8 = vadd.f32 1.0, %v2138_v5  ;;  %v1770_v5 = vmul.f32 -1.442695, %v2653_v1 }
 0x133   :  { %v2142_v9 = vpop.eup %2141  ;;  %2161 = vrcp.f32 %v1000_v6  ;;  %v1015_v10 = vadd.f32 1.0, %v2140_v7  ;;  %v2659_v13 = vpop.f32.mrb[12].mxu0 }
 0x134   :  { %v2144_v11 = vpop.eup %2143  ;;  %2163 = vrcp.f32 %v1001_v8  ;;  %v1002_v12 = vadd.f32 1.0, %v2142_v9  ;;  %v2661_v14 = vpop.f32.mrb[12].mxu1  ;;  %v1751_v9 = vmul.f32 -1.442695, %v2655_v3 }
 0x135   :  { %2942 = vst [vmem:[#allocation13_spill] sm:$0xff] %v2661_v14  ;;  %v2146_v15 = vpop.eup %2145  ;;  %2165 = vrcp.f32 %v1015_v10  ;;  %v1009_v16 = vadd.f32 1.0, %v2144_v11  ;;  %v2664_v20 = vpop.f32.mrb[13].mxu0 }
 0x136   :  { %v2148_v23 = vpop.eup %2147  ;;  %2167 = vrcp.f32 %v1002_v12  ;;  %v1004_v24 = vadd.f32 1.0, %v2146_v15  ;;  %v2667_v30 = vpop.f32.mrb[13].mxu1 }
 0x137   :  { %2943 = vst [vmem:[#allocation14_spill] sm:$0xff] %v2667_v30  ;;  %v2669_v31 = vpop.f32.mrb[14].mxu0  ;;  %v2671_v32 = vpop.eup %2149  ;;  %2169 = vrcp.f32 %v1009_v16  ;;  %v1139_v52 = vmul.f32 %v2148_v23, %v2598_v17 }
 0x138   :  { %2944 = vst [vmem:[#allocation15_spill] sm:$0xff] %v2669_v31  ;;  %v2674_v36 = vpop.f32.mrb[14].mxu1  ;;  %v2676_v39 = vpop.f32.mrb[15].mxu0  ;;  %2171 = vrcp.f32 %v1004_v24 }
 0x139   :  { %2945 = vst [vmem:[#allocation16_spill] sm:$0xff] %v2674_v36  ;;  %2946 = vst [vmem:[#allocation17_spill] sm:$0xff] %v2676_v39  ;;  %v2152_v40 = vpop.eup %2151  ;;  %v2679_v46 = vpop.f32.mrb[15].mxu1  ;;  %2173 = vpow2.f32 %v1758_v19 }
 0x13a   :  { %2947 = vst [vmem:[#allocation18_spill] sm:$0xff] %v2679_v46  ;;  %v2681_v47 = vpop.eup %2153  ;;  %2175 = vpow2.f32 %v1745_v27  ;;  %v1140_v58 = vmul.f32 %v2152_v40, %v2604_v21  ;;  %v1779_v40 = vmul.f32 -1.442695, %v2661_v14  ;;  %v1757_v14 = vmul.f32 -1.442695, %v2676_v39 }
 0x13b   :  { %v2156_v49 = vpop.eup %2155  ;;  %2177 = vpow2.f32 %v1752_v35  ;;  %v2691_v62 = vpop.f32.mrb[16].mxu0 }
 0x13c   :  { %v2685_v51 = vpop.eup %2157  ;;  %2179 = vpow2.f32 %v1747_v43  ;;  %2948 = vst [vmem:[#allocation19_spill] sm:$0xff] %v2691_v62  ;;  %v675_v63 = vpop.f32.mrb[16].mxu1  ;;  %v1142_v2 = vmul.f32 %v2156_v49, %v2610_v25  ;;  %v1764_v25 = vmul.f32 -1.442695, %v2657_v4 }
 0x13d   :  { %v2160_v56 = vpop.eup %2159  ;;  %2181 = vpow2.f32 %v1767_v48  ;;  %v1187_v17 = vmul.f32 %v1139_v52, %v675_v63  ;;  %v2697_v6 = vpop.f32.mrb[17].mxu0 }
 0x13e   :  { %v2693_v0 = vpop.eup %2161  ;;  %2949 = vst [vmem:[#allocation20_spill] sm:$0xff] %v2697_v6  ;;  %v677_v7 = vpop.f32.mrb[17].mxu1  ;;  %v1143_v21 = vmul.f32 %v2160_v56, %v2615_v28  ;;  %2183 = vpow2.f32 %v1748_v50  ;;  %v1753_v28 = vmul.f32 -1.442695, %v2659_v13 }
 0x13f   :  { %v2164_v8 = vpop.eup %2163  ;;  %v1188_v10 = vmul.f32 %v1140_v58, %v677_v7  ;;  %v2701_v11 = vpop.f32.mrb[18].mxu0  ;;  %2185 = vpow2.f32 %v1761_v55 }
 0x140   :  { %v679_v12 = vpop.f32.mrb[18].mxu1  ;;  %v2703_v15 = vpop.eup %2165  ;;  %2187 = vpow2.f32 %v1750_v59  ;;  %v1145_v52 = vmul.f32 %v2164_v8, %v2622_v33 }
 0x141   :  { %v1190_v16 = vmul.f32 %v1142_v2, %v679_v12  ;;  %v2706_v19 = vpop.f32.mrb[19].mxu0  ;;  %v681_v23 = vpop.f32.mrb[19].mxu1  ;;  %2189 = vpow2.f32 %v1770_v5 }
 0x142   :  { %v2168_v24 = vpop.eup %2167  ;;  %v1191_v27 = vmul.f32 %v1143_v21, %v681_v23  ;;  %2191 = vpow2.f32 %v1751_v9 }
 0x143   :  { %v2709_v35 = vpop.eup %2169  ;;  %v1235_v43 = vpack.c.bf16 %v1190_v16, %v1187_v17  ;;  %2193 = vpow2.f32 %v1764_v25  ;;  %v1146_v56 = vmul.f32 %v2168_v24, %v2628_v37  ;;  %v2714_v59 = vpop.f32.mrb[20].mxu0 }
 0x144   :  { %v2172_v48 = vpop.eup %2171  ;;  %v1236_v49 = vpack.c.bf16 %v1191_v27, %v1188_v10  ;;  %2195 = vpow2.f32 %v1753_v28  ;;  %v685_v63 = vpop.f32.mrb[20].mxu1 }
 0x145   :  { %v2174_v50 = vpop.eup %2173  ;;  %v1148_v5 = vmul.f32 %v2172_v48, %v2634_v41  ;;  %2197 = vpow2.f32 %v1779_v40  ;;  %v2717_v7 = vmul.f32 %v1145_v52, %v685_v63  ;;  %v2719_v21 = vpop.f32.mrb[21].mxu0 }
 0x146   :  { %v2176_v55 = vpop.eup %2175  ;;  %v1018_v58 = vadd.f32 1.0, %v2174_v50  ;;  %1483 = vmatprep.mubr.bf16.mxu0 %v1236_v49  ;;  %v687_v33 = vpop.f32.mrb[21].mxu1 }
 0x147   :  { %v2178_v2 = vpop.eup %2177  ;;  %v1005_v17 = vadd.f32 1.0, %v2176_v55  ;;  %1484 = vmatmul.mubr.bf16.vlgmr.msra.gmra.mrb[48].mxu0 %v1235_v43  ;;  %v2721_v9 = vmul.f32 %v1146_v56, %v687_v33  ;;  %v2723_v10 = vpop.f32.mrb[22].mxu0 }
 0x148   :  { %v2180_v8 = vpop.eup %2179  ;;  %2199 = vrcp.f32 %v1018_v58  ;;  %v1012_v37 = vadd.f32 1.0, %v2178_v2  ;;  %v689_v12 = vpop.f32.mrb[22].mxu1 }
 0x149   :  { %v2182_v25 = vpop.eup %2181  ;;  %2201 = vrcp.f32 %v1005_v17  ;;  %v1007_v16 = vadd.f32 1.0, %v2180_v8  ;;  %v2725_v41 = vmul.f32 %v1148_v5, %v689_v12  ;;  %v2727_v23 = vpop.f32.mrb[23].mxu0 }
 0x14a   :  { %v691_v24 = vpop.f32.mrb[23].mxu1  ;;  %v2184_v28 = vpop.eup %2183  ;;  %2203 = vrcp.f32 %v1012_v37  ;;  %v1027_v27 = vadd.f32 1.0, %v2182_v25 }
 0x14b   :  { %v2186_v40 = vpop.eup %2185  ;;  %2205 = vrcp.f32 %v1007_v16  ;;  %v1008_v43 = vadd.f32 1.0, %v2184_v28  ;;  %v2731_v63 = vpop.f32.mrb[24].mxu0 }
 0x14c   :  { %v2188_v49 = vpop.eup %2187  ;;  %2207 = vrcp.f32 %v1027_v27  ;;  %v1021_v50 = vadd.f32 1.0, %v2186_v40  ;;  %v695_v2 = vpop.f32.mrb[24].mxu1  ;;  %v1754_v40 = vmul.f32 -1.442695, %v2664_v20 }
 0x14d   :  { %v2190_v52 = vpop.eup %2189  ;;  %2209 = vrcp.f32 %v1008_v43  ;;  %v1010_v55 = vadd.f32 1.0, %v2188_v49  ;;  %v2733_v33 = vpop.f32.mrb[25].mxu0 }
 0x14e   :  { %v2192_v56 = vpop.eup %2191  ;;  %2211 = vrcp.f32 %v1021_v50  ;;  %v1030_v58 = vadd.f32 1.0, %v2190_v52  ;;  %v697_v8 = vpop.f32.mrb[25].mxu1 }
 0x14f   :  { %v2194_v5 = vpop.eup %2193  ;;  %2213 = vrcp.f32 %v1010_v55  ;;  %v1011_v17 = vadd.f32 1.0, %v2192_v56  ;;  %v2735_v25 = vpop.f32.mrb[26].mxu0  ;;  %v1773_v55 = vmul.f32 -1.442695, %v2667_v30 }
 0x150   :  { %v2196_v37 = vpop.eup %2195  ;;  %2215 = vrcp.f32 %v1030_v58  ;;  %v1024_v12 = vadd.f32 1.0, %v2194_v5  ;;  %v699_v16 = vpop.f32.mrb[26].mxu1  ;;  %v1756_v58 = vmul.f32 -1.442695, %v2669_v31 }
 0x151   :  { %v2198_v28 = vpop.eup %2197  ;;  %2217 = vrcp.f32 %v1011_v17  ;;  %v1013_v27 = vadd.f32 1.0, %v2196_v37  ;;  %v2738_v43 = vpop.f32.mrb[27].mxu0  ;;  %v1782_v37 = vmul.f32 -1.442695, %v2674_v36 }
 0x152   :  { %v2740_v49 = vpop.f32.mrb[27].mxu1  ;;  %v2742_v50 = vpop.eup %2199  ;;  %2219 = vrcp.f32 %v1024_v12  ;;  %v1039_v52 = vadd.f32 1.0, %v2198_v28  ;;  %v1776_v28 = vmul.f32 -1.442695, %v2679_v46  ;;  %v1762_v46 = vmul.f32 -1.442695, %v2701_v11 }
 0x153   :  { %v2202_v56 = vpop.eup %2201  ;;  %2221 = vrcp.f32 %v1013_v27  ;;  %v2755_v30 = vpop.f32.mrb[28].mxu0 }
 0x154   :  { %v2746_v5 = vpop.eup %2203  ;;  %v1149_v17 = vmul.f32 %v2202_v56, %v2639_v44  ;;  %2223 = vrcp.f32 %v1039_v52  ;;  %v705_v31 = vpop.f32.mrb[28].mxu1  ;;  %v1759_v44 = vmul.f32 -1.442695, %v2691_v62  ;;  %v1760_v52 = vmul.f32 -1.442695, %v2697_v6 }
 0x155   :  { %v2206_v48 = vpop.eup %2205  ;;  %2225 = vpow2.f32 %v1754_v40  ;;  %v2759_v40 = vpop.f32.mrb[29].mxu0 }
 0x156   :  { %v2751_v4 = vpop.eup %2207  ;;  %v1151_v12 = vmul.f32 %v2206_v48, %v2643_v53  ;;  %2227 = vpow2.f32 %v1773_v55  ;;  %v1197_v27 = vmul.f32 %v1149_v17, %v691_v24  ;;  %v2761_v56 = vpop.f32.mrb[29].mxu1 }
 0x157   :  { %v2210_v1 = vpop.eup %2209  ;;  %2229 = vpow2.f32 %v1756_v58  ;;  %v2769_v55 = vpop.f32.mrb[30].mxu0 }
 0x158   :  { %v2763_v36 = vpop.eup %2211  ;;  %v1152_v53 = vmul.f32 %v2210_v1, %v2647_v57  ;;  %2231 = vpow2.f32 %v1782_v37  ;;  %v1239_v24 = vpack.c.bf16 %v1197_v27, %v2721_v9  ;;  %v2767_v48 = vmul.f32 %v1151_v12, %v695_v2  ;;  %v2771_v58 = vpop.f32.mrb[30].mxu1 }
 0x159   :  { %v2214_v17 = vpop.eup %2213  ;;  %2233 = vpow2.f32 %v1757_v14  ;;  %v2774_v6 = vpop.f32.mrb[31].mxu0  ;;  %v1763_v1 = vmul.f32 -1.442695, %v2706_v19  ;;  %v1765_v37 = vmul.f32 -1.442695, %v2714_v59  ;;  %v2950_v14 = vpack.c.bf16 %v2725_v41, %v2717_v7 }
 0x15a   :  { %v2776_v62 = vpop.f32.mrb[31].mxu1  ;;  %v2778_v39 = vpop.eup %2215  ;;  %v1154_v57 = vmul.f32 %v2214_v17, %v2651_v61  ;;  %2235 = vpow2.f32 %v1776_v28  ;;  %1491 = vmatprep.mubr.bf16.mxu0 %v1239_v24  ;;  %v1200_v9 = vmul.f32 %v1152_v53, %v697_v8  ;;  %v1766_v61 = vmul.f32 -1.442695, %v2719_v21 }
 0x15b   :  { %v2218_v2 = vpop.eup %2217  ;;  %2237 = vpow2.f32 %v1759_v44  ;;  %1492 = vmatmul.mubr.bf16.gmra.mrb[52].mxu0 %v2950_v14  ;;  %v1147_v8 = vmul.f32 %v2671_v32, %v2600_v18  ;;  %v1141_v44 = vmul.f32 %v2681_v47, %v2606_v22  ;;  %v1768_v53 = vmul.f32 -1.442695, %v2723_v10  ;;  %v1969_v24 = vpop.f32.mrb[32].mxu0 }
 0x15c   :  { %v2786_v12 = vpop.eup %2219  ;;  %v1155_v27 = vmul.f32 %v2218_v2, %v2655_v3  ;;  %2239 = vpow2.f32 %v1760_v52  ;;  %v1202_v28 = vmul.f32 %v1154_v57, %v699_v16  ;;  %v2800_v16 = vpop.f32.mrb[32].mxu1  ;;  %v1150_v18 = vmul.f32 %v2685_v51, %v2612_v26 }
 0x15d   :  { %v2222_v17 = vpop.eup %2221  ;;  %2241 = vpow2.f32 %v1762_v46  ;;  %v1144_v22 = vmul.f32 %v2693_v0, %v2617_v29  ;;  %v1195_v32 = vmul.f32 %v1969_v24, %v1147_v8  ;;  %v2806_v46 = vpop.f32.mrb[33].mxu1 }
 0x15e   :  { %v2795_v7 = vpop.eup %2223  ;;  %v1157_v41 = vmul.f32 %v2222_v17, %v2659_v13  ;;  %2243 = vpow2.f32 %v1763_v1  ;;  %v1241_v3 = vpack.c.bf16 %v1202_v28, %v2767_v48  ;;  %v1203_v52 = vmul.f32 %v1155_v27, %v2740_v49  ;;  %v788_v13 = vpop.f32.mrb[33].mxu0 }
 0x15f   :  { %v2226_v57 = vpop.eup %2225  ;;  %2245 = vpow2.f32 %v1765_v37  ;;  %v2810_v2 = vpop.f32.mrb[34].mxu1  ;;  %v1189_v26 = vmul.f32 %v1141_v44, %v788_v13  ;;  %v1159_v44 = vmul.f32 %v2703_v15, %v2624_v34  ;;  %v1162_v34 = vmul.f32 %v2742_v50, %v2636_v42 }
 0x160   :  { %v2228_v47 = vpop.eup %2227  ;;  %v1014_v1 = vadd.f32 1.0, %v2226_v57  ;;  %2247 = vpow2.f32 %v1766_v61  ;;  %v1242_v48 = vpack.c.bf16 %v1203_v52, %v1200_v9  ;;  %v2808_v49 = vmul.f32 %v1157_v41, %v705_v31  ;;  %v1970_v14 = vpop.f32.mrb[34].mxu0 }
 0x161   :  { %v2230_v27 = vpop.eup %2229  ;;  %v1033_v28 = vadd.f32 1.0, %v2228_v47  ;;  %2249 = vpow2.f32 %v1768_v53  ;;  %v1198_v51 = vmul.f32 %v1970_v14, %v1150_v18  ;;  %v2812_v29 = vpop.f32.mrb[35].mxu1  ;;  %v1769_v18 = vmul.f32 -1.442695, %v2727_v23 }
 0x162   :  { %v791_v0 = vpop.f32.mrb[35].mxu0  ;;  %v2232_v37 = vpop.eup %2231  ;;  %2251 = vrcp.f32 %v1014_v1  ;;  %v1016_v17 = vadd.f32 1.0, %v2230_v27  ;;  %1499 = vmatprep.mubr.bf16.mxu0 %v1242_v48  ;;  %v1772_v50 = vmul.f32 -1.442695, %v2733_v33 }
 0x163   :  { %v1192_v8 = vmul.f32 %v1144_v22, %v791_v0  ;;  %v2234_v61 = vpop.eup %2233  ;;  %2253 = vrcp.f32 %v1033_v28  ;;  %v1042_v31 = vadd.f32 1.0, %v2232_v37  ;;  %1500 = vmatmul.mubr.bf16.gmra.mrb[56].mxu0 %v1241_v3  ;;  %v1240_v9 = vpack.c.bf16 %v1198_v51, %v1195_v32  ;;  %v1973_v1 = vpop.f32.mrb[36].mxu0 }
 0x164   :  { %v2236_v41 = vpop.eup %2235  ;;  %2255 = vrcp.f32 %v1016_v17  ;;  %v1017_v52 = vadd.f32 1.0, %v2234_v61  ;;  %v1153_v22 = vmul.f32 %v2709_v35, %v2630_v38  ;;  %v2820_v3 = vmul.f32 -1.442695, %v2731_v63  ;;  %v2822_v32 = vpop.f32.mrb[36].mxu1 }
 0x165   :  { %v1237_v24 = vpack.c.bf16 %v1192_v8, %v1189_v26  ;;  %v2238_v53 = vpop.eup %2237  ;;  %2257 = vrcp.f32 %v1042_v31  ;;  %v1036_v57 = vadd.f32 1.0, %v2236_v41  ;;  %v1207_v14 = vmul.f32 %v1973_v1, %v1159_v44  ;;  %v2826_v27 = vpop.f32.mrb[37].mxu1 }
 0x166   :  { %v2240_v13 = vpop.eup %2239  ;;  %2259 = vrcp.f32 %v1017_v52  ;;  %v1019_v47 = vadd.f32 1.0, %v2238_v53  ;;  %v804_v28 = vpop.f32.mrb[37].mxu0  ;;  %v1156_v35 = vmul.f32 %v2746_v5, %v2641_v45  ;;  %v1774_v45 = vmul.f32 -1.442695, %v2735_v25 }
 0x167   :  { %1999 = vmatprep.mubr.bf16.mxu1 %v1237_v24  ;;  %v2242_v48 = vpop.eup %2241  ;;  %2261 = vrcp.f32 %v1036_v57  ;;  %v1020_v15 = vadd.f32 1.0, %v2240_v13  ;;  %v1201_v51 = vmul.f32 %v1153_v22, %v804_v28  ;;  %v2830_v0 = vpop.f32.mrb[38].mxu1  ;;  %v1775_v53 = vmul.f32 -1.442695, %v2738_v43 }
 0x168   :  { %2000 = vmatmul.mubr.bf16.vlgmr.msra.gmra.mrb[48].mxu1 %v1240_v9  ;;  %v2244_v38 = vpop.eup %2243  ;;  %2263 = vrcp.f32 %v1019_v47  ;;  %v1022_v26 = vadd.f32 1.0, %v2242_v48  ;;  %v1974_v37 = vpop.f32.mrb[38].mxu0  ;;  %v1171_v13 = vmul.f32 %v2751_v4, %v2645_v54  ;;  %v1165_v48 = vmul.f32 %v2763_v36, %v2649_v60  ;;  %v2952_v60 = vld [vmem:[#allocation15_spill] sm:$0xff] }
 0x169   :  { %v2246_v17 = vpop.eup %2245  ;;  %2265 = vrcp.f32 %v1020_v15  ;;  %v1023_v42 = vadd.f32 1.0, %v2244_v38  ;;  %v1210_v8 = vmul.f32 %v1974_v37, %v1162_v34  ;;  %v2833_v61 = vpop.f32.mrb[39].mxu1  ;;  %v1777_v15 = vmul.f32 -1.442695, %v2755_v30  ;;  %v2951_v38 = vld [vmem:[#allocation11_spill] sm:$0xff] }
 0x16a   :  { %v807_v31 = vpop.f32.mrb[39].mxu0  ;;  %v2248_v9 = vpop.eup %2247  ;;  %2267 = vrcp.f32 %v1022_v26  ;;  %v1025_v41 = vadd.f32 1.0, %v2246_v17  ;;  %v1780_v54 = vmul.f32 -1.442695, %v2769_v55 }
 0x16b   :  { %v1204_v5 = vmul.f32 %v1156_v35, %v807_v31  ;;  %v2250_v52 = vpop.eup %2249  ;;  %2269 = vrcp.f32 %v1023_v42  ;;  %v1026_v24 = vadd.f32 1.0, %v2248_v9  ;;  %v1246_v44 = vpack.c.bf16 %v1210_v8, %v1207_v14  ;;  %v1977_v26 = vpop.f32.mrb[40].mxu0  ;;  %v2953_v8 = vld [vmem:[#allocation12_spill] sm:$0xff] }
 0x16c   :  { %v2252_v57 = vpop.eup %2251  ;;  %2271 = vrcp.f32 %v1025_v41  ;;  %v1028_v22 = vadd.f32 1.0, %v2250_v52  ;;  %v1174_v14 = vmul.f32 %v2778_v39, %v2951_v38  ;;  %v1778_v35 = vmul.f32 -1.442695, %v2759_v40  ;;  %v2847_v4 = vpop.f32.mrb[40].mxu1 }
 0x16d   :  { %v1243_v47 = vpack.c.bf16 %v1204_v5, %v1201_v51  ;;  %v2254_v1 = vpop.eup %2253  ;;  %v1158_v34 = vmul.f32 %v2252_v57, %v2664_v20  ;;  %2273 = vrcp.f32 %v1026_v24  ;;  %v1219_v37 = vmul.f32 %v1977_v26, %v1171_v13  ;;  %v2851_v17 = vpop.f32.mrb[41].mxu1  ;;  %v2954_v24 = vld [vmem:[#allocation17_spill] sm:$0xff]  ;;  %v2957_v26 = vld [vmem:[#allocation19_spill] sm:$0xff] }
 0x16e   :  { %v2256_v28 = vpop.eup %2255  ;;  %2275 = vrcp.f32 %v1028_v22  ;;  %v820_v42 = vpop.f32.mrb[41].mxu0  ;;  %v1168_v31 = vmul.f32 %v2786_v12, %v2953_v8  ;;  %v1781_v9 = vmul.f32 -1.442695, %v2774_v6  ;;  %v2955_v12 = vld [vmem:[#allocation13_spill] sm:$0xff] }
 0x16f   :  { %2003 = vmatprep.mubr.bf16.mxu1 %v1243_v47  ;;  %v2258_v51 = vpop.eup %2257  ;;  %v1160_v36 = vmul.f32 %v2256_v28, %v2952_v60  ;;  %2277 = vpow2.f32 %v1769_v18  ;;  %v1206_v20 = vmul.f32 %v1158_v34, %v2761_v56  ;;  %v1213_v41 = vmul.f32 %v1165_v48, %v820_v42  ;;  %v2857_v5 = vpop.f32.mrb[42].mxu1  ;;  %v2956_v34 = vld [vmem:[#allocation14_spill] sm:$0xff] }
 0x170   :  { %2004 = vmatmul.mubr.bf16.gmra.mrb[52].mxu1 %v1246_v44  ;;  %v2260_v39 = vpop.eup %2259  ;;  %2279 = vpow2.f32 %v2820_v3  ;;  %v1978_v52 = vpop.f32.mrb[42].mxu0  ;;  %v1183_v3 = vmul.f32 %v2795_v7, %v2955_v12  ;;  %v1177_v28 = vmul.f32 %v2254_v1, %v2956_v34 }
 0x171   :  { %v2262_v18 = vpop.eup %2261  ;;  %v1161_v56 = vmul.f32 %v2260_v39, %v2954_v24  ;;  %2281 = vpow2.f32 %v1772_v50  ;;  %v1208_v57 = vmul.f32 %v1160_v36, %v2771_v58  ;;  %v1222_v13 = vmul.f32 %v1978_v52, %v1174_v14  ;;  %v2861_v44 = vpop.f32.mrb[43].mxu1  ;;  %v2958_v36 = vld [vmem:[#allocation20_spill] sm:$0xff] }
 0x172   :  { %v823_v22 = vpop.f32.mrb[43].mxu0  ;;  %v2264_v47 = vpop.eup %2263  ;;  %2283 = vpow2.f32 %v1774_v45  ;;  %v2959_v24 = vld [vmem:[#allocation16_spill] sm:$0xff] }
 0x173   :  { %v1216_v48 = vmul.f32 %v1168_v31, %v823_v22  ;;  %v2266_v38 = vpop.eup %2265  ;;  %v1163_v60 = vmul.f32 %v2264_v47, %v2957_v26  ;;  %2285 = vpow2.f32 %v1775_v53  ;;  %v1244_v50 = vpack.c.bf16 %v1208_v57, %v2808_v49 }
 0x174   :  { %v1209_v58 = vmul.f32 %v1161_v56, %v2776_v62  ;;  %v2268_v14 = vpop.eup %2267  ;;  %v1164_v42 = vmul.f32 %v2266_v38, %v2958_v36  ;;  %2287 = vpow2.f32 %v1777_v15  ;;  %v1252_v39 = vpack.c.bf16 %v1222_v13, %v1219_v37  ;;  %v2875_v56 = vpop.f32.mrb[44].mxu1 }
 0x175   :  { %v1249_v8 = vpack.c.bf16 %v1216_v48, %v1213_v41  ;;  %v2270_v52 = vpop.eup %2269  ;;  %v1166_v7 = vmul.f32 %v2268_v14, %v2701_v11  ;;  %2289 = vpow2.f32 %v1778_v35  ;;  %v1211_v1 = vmul.f32 %v1163_v60, %v2800_v16  ;;  %v1981_v15 = vpop.f32.mrb[44].mxu0 }
 0x176   :  { %v1245_v45 = vpack.c.bf16 %v1209_v58, %v1206_v20  ;;  %v2272_v31 = vpop.eup %2271  ;;  %v1186_v53 = vmul.f32 %v2258_v51, %v2959_v24  ;;  %v1167_v49 = vmul.f32 %v2270_v52, %v2706_v19  ;;  %2291 = vpow2.f32 %v1780_v54  ;;  %v2879_v35 = vpop.f32.mrb[45].mxu1  ;;  %v2960_v54 = vld [vmem:[#allocation18_spill] sm:$0xff] }
 0x177   :  { %v1212_v62 = vmul.f32 %v1164_v42, %v2806_v46  ;;  %2007 = vmatprep.mubr.bf16.mxu1 %v1249_v8  ;;  %v2274_v37 = vpop.eup %2273  ;;  %v1169_v41 = vmul.f32 %v2272_v31, %v2714_v59  ;;  %2293 = vpow2.f32 %v1781_v9  ;;  %v1214_v11 = vmul.f32 %v1166_v7, %v2810_v2  ;;  %v836_v51 = vpop.f32.mrb[45].mxu0 }
 0x178   :  { %1507 = vmatprep.mubr.bf16.mxu0 %v1245_v45  ;;  %v1231_v16 = vmul.f32 %v1981_v15, %v1183_v3  ;;  %2008 = vmatmul.mubr.bf16.gmra.mrb[56].mxu1 %v1252_v39  ;;  %v2276_v19 = vpop.eup %2275  ;;  %v1180_v20 = vmul.f32 %v2262_v18, %v2960_v54  ;;  %v1170_v46 = vmul.f32 %v2274_v37, %v2719_v21  ;;  %v2884_v22 = vpop.f32.mrb[46].mxu1 }
 0x179   :  { %1508 = vmatmul.mubr.bf16.gmra.mrb[60].mxu0 %v1244_v50  ;;  %v1215_v57 = vmul.f32 %v1167_v49, %v2812_v29  ;;  %v1225_v13 = vmul.f32 %v1177_v28, %v836_v51  ;;  %v1982_v59 = vpop.f32.mrb[46].mxu0  ;;  %v2278_v9 = vpop.eup %2277  ;;  %v1172_v2 = vmul.f32 %v2276_v19, %v2723_v10  ;;  %v1247_v47 = vpack.c.bf16 %v1214_v11, %v1211_v1 }
 0x17a   :  { %v2888_v12 = vmul.f32 %v1169_v41, %v2822_v32  ;;  %v1234_v3 = vmul.f32 %v1982_v59, %v1186_v53  ;;  %v2890_v34 = vpop.f32.mrb[47].mxu1  ;;  %v839_v18 = vpop.f32.mrb[47].mxu0  ;;  %v1029_v21 = vadd.f32 1.0, %v2278_v9  ;;  %v1218_v29 = vmul.f32 %v1170_v46, %v2826_v27 }
 0x17b   :  { %v2280_v48 = vpop.eup %2279  ;;  %v1248_v38 = vpack.c.bf16 %v1215_v57, %v1212_v62  ;;  %v1228_v28 = vmul.f32 %v1180_v20, %v839_v18  ;;  %v1220_v50 = vmul.f32 %v1172_v2, %v2830_v0 }
 0x17c   :  { %v2282_v26 = vpop.eup %2281  ;;  %v1031_v60 = vadd.f32 1.0, %v2280_v48  ;;  %v1258_v58 = vpack.c.bf16 %v1234_v3, %v1231_v16  ;;  %2295 = vrcp.f32 %v1029_v21 }
 0x17d   :  { %v2284_v10 = vpop.eup %2283  ;;  %v1032_v14 = vadd.f32 1.0, %v2282_v26  ;;  %1515 = vmatprep.mubr.bf16.mxu0 %v1248_v38  ;;  %v1255_v32 = vpack.c.bf16 %v1228_v28, %v1225_v13  ;;  %v1250_v39 = vpack.c.bf16 %v1220_v50, %v2888_v12 }
 0x17e   :  { %v2286_v36 = vpop.eup %2285  ;;  %2297 = vrcp.f32 %v1031_v60  ;;  %v1034_v42 = vadd.f32 1.0, %v2284_v10 }
 0x17f   :  { %v2288_v8 = vpop.eup %2287  ;;  %2299 = vrcp.f32 %v1032_v14  ;;  %v1035_v52 = vadd.f32 1.0, %v2286_v36  ;;  %2011 = vmatprep.mubr.bf16.mxu1 %v1255_v32 }
 0x180   :  { %v2290_v27 = vpop.eup %2289  ;;  %2301 = vrcp.f32 %v1034_v42  ;;  %v1037_v7 = vadd.f32 1.0, %v2288_v8  ;;  %2012 = vmatmul.mubr.bf16.gmra.mrb[60].mxu1 %v1258_v58 }
 0x181   :  { %v2292_v0 = vpop.eup %2291  ;;  %2303 = vrcp.f32 %v1035_v52  ;;  %v1038_v45 = vadd.f32 1.0, %v2290_v27  ;;  %1516 = vmatmul.mubr.bf16.gmra.mrb[64].mxu0 %v1247_v47 }
 0x182   :  { %v2294_v1 = vpop.eup %2293  ;;  %2305 = vrcp.f32 %v1037_v7  ;;  %v1040_v31 = vadd.f32 1.0, %v2292_v0 }
 0x183   :  { %2307 = vrcp.f32 %v1038_v45  ;;  %v1041_v24 = vadd.f32 1.0, %v2294_v1 }
 0x184   :  { %2309 = vrcp.f32 %v1040_v31 }
 0x185   :  { %2311 = vrcp.f32 %v1041_v24 }
 0x186   :  { %v2296_v53 = vpop.eup %2295 }
 0x187   :  { %v1173_v62 = vmul.f32 %v2296_v53, %v2727_v23 }
 0x188   :  { %v2298_v49 = vpop.eup %2297 }
 0x189   :  { %v2300_v15 = vpop.eup %2299  ;;  %v1175_v37 = vmul.f32 %v2298_v49, %v2731_v63  ;;  %v1221_v16 = vmul.f32 %v1173_v62, %v2833_v61 }
 0x18a   :  { %v2302_v41 = vpop.eup %2301  ;;  %v1176_v11 = vmul.f32 %v2300_v15, %v2733_v33 }
 0x18b   :  { %v2304_v51 = vpop.eup %2303  ;;  %v1178_v19 = vmul.f32 %v2302_v41, %v2735_v25  ;;  %v1223_v54 = vmul.f32 %v1175_v37, %v2847_v4  ;;  %v1251_v57 = vpack.c.bf16 %v1221_v16, %v1218_v29 }
 0x18c   :  { %v2306_v20 = vpop.eup %2305  ;;  %v1179_v46 = vmul.f32 %v2304_v51, %v2738_v43  ;;  %v1224_v13 = vmul.f32 %v1176_v11, %v2851_v17 }
 0x18d   :  { %v2308_v23 = vpop.eup %2307  ;;  %v1181_v59 = vmul.f32 %v2306_v20, %v2755_v30  ;;  %v1226_v63 = vmul.f32 %v1178_v19, %v2857_v5  ;;  %1523 = vmatprep.mubr.bf16.mxu0 %v1251_v57 }
 0x18e   :  { %v2310_v9 = vpop.eup %2309  ;;  %v1182_v33 = vmul.f32 %v2308_v23, %v2759_v40  ;;  %v1227_v61 = vmul.f32 %v1179_v46, %v2861_v44  ;;  %1524 = vmatmul.mubr.bf16.gmra.mrb[68].mxu0 %v1250_v39 }
 0x18f   :  { %v2312_v25 = vpop.eup %2311  ;;  %v1184_v4 = vmul.f32 %v2310_v9, %v2769_v55  ;;  %v1253_v2 = vpack.c.bf16 %v1226_v63, %v1223_v54  ;;  %v1229_v43 = vmul.f32 %v1181_v59, %v2875_v56 }
 0x190   :  { %v1185_v17 = vmul.f32 %v2312_v25, %v2774_v6  ;;  %v1254_v47 = vpack.c.bf16 %v1227_v61, %v1224_v13  ;;  %v1230_v30 = vmul.f32 %v1182_v33, %v2879_v35 }
 0x191   :  { %v1232_v5 = vmul.f32 %v1184_v4, %v2884_v22 }
 0x192   :  { %1531 = vmatprep.mubr.bf16.mxu0 %v1254_v47  ;;  %v1233_v40 = vmul.f32 %v1185_v17, %v2890_v34 }
 0x193   :  { %v1256_v12 = vpack.c.bf16 %v1232_v5, %v1229_v43 }
 0x194   :  { %v1257_v3 = vpack.c.bf16 %v1233_v40, %v1230_v30 }
 0x196   :  { %1532 = vmatmul.mubr.bf16.gmra.mrb[72].mxu0 %v1253_v2 }
 0x197   :  { %1539 = vmatprep.mubr.bf16.mxu0 %v1257_v3 }
 0x19e   :  { %1540 = vmatmul.mubr.bf16.gmra.mrb[76].mxu0 %v1256_v12 }
 0x21a   :  { %v1855_v55 = vpop.f32.mrb[48].mxu0 }
 0x21b   :  { %v1856_v44 = vpop.f32.mrb[49].mxu0 }
 0x21c   :  { %v1857_v18 = vadd.f32 %v1856_v44, %v1855_v55  ;;  %v1858_v48 = vpop.f32.mrb[50].mxu0 }
 0x21d   :  { %v1859_v56 = vpop.f32.mrb[51].mxu0 }
 0x21e   :  { %v1860_v21 = vadd.f32 %v1859_v56, %v1858_v48 }
 0x22e   :  { %v1861_v6 = vpop.f32.mrb[52].mxu0 }
 0x22f   :  { %v1862_v38 = vpop.f32.mrb[53].mxu0 }
 0x230   :  { %v1863_v29 = vadd.f32 %v1862_v38, %v1861_v6  ;;  %v1864_v35 = vpop.f32.mrb[54].mxu0 }
 0x231   :  { %v1865_v28 = vpop.f32.mrb[55].mxu0 }
 0x232   :  { %v1866_v22 = vadd.f32 %v1865_v28, %v1864_v35 }
 0x236   :  { %v1867_v26 = vpop.f32.mrb[56].mxu0 }
 0x237   :  { %v1868_v60 = vpop.f32.mrb[57].mxu0 }
 0x238   :  { %v1869_v34 = vadd.f32 %v1868_v60, %v1867_v26  ;;  %v1870_v50 = vpop.f32.mrb[58].mxu0 }
 0x239   :  { %v1871_v58 = vpop.f32.mrb[59].mxu0 }
 0x23a   :  { %v1872_v10 = vadd.f32 %v1871_v58, %v1870_v50 }
 0x23b   :  { %v2001_v14 = vpop.f32.mrb[48].mxu1 }
 0x23c   :  { %v1591_v32 = vadd.f32 %v2001_v14, %v1863_v29  ;;  %v1582_v36 = vpop.f32.mrb[49].mxu1 }
 0x23d   :  { %v1583_v42 = vadd.f32 %v1857_v18, %v1582_v36  ;;  %v2002_v39 = vpop.f32.mrb[50].mxu1 }
 0x23e   :  { %1647 = vst [vmem:[#allocation7 + $0x10] sm:$0xff] %v1591_v32  ;;  %v1594_v8 = vadd.f32 %v2002_v39, %v1866_v22  ;;  %v1585_v52 = vpop.f32.mrb[51].mxu1 }
 0x23f   :  { %1645 = vst [vmem:[#allocation7] sm:$0xff] %v1583_v42  ;;  %v1586_v27 = vadd.f32 %v1860_v21, %v1585_v52 }
 0x240   :  { %1648 = vst [vmem:[#allocation7 + $0x18] sm:$0xff] %v1594_v8 }
 0x241   :  { %1646 = vst [vmem:[#allocation7 + $0x8] sm:$0xff] %v1586_v27 }
 0x243   :  { %v2005_v7 = vpop.f32.mrb[52].mxu1 }
 0x244   :  { %v1598_v0 = vpop.f32.mrb[53].mxu1 }
 0x245   :  { %v1599_v45 = vadd.f32 %v1869_v34, %v1598_v0  ;;  %v2006_v1 = vpop.f32.mrb[54].mxu1 }
 0x246   :  { %v1601_v31 = vpop.f32.mrb[55].mxu1 }
 0x247   :  { %1649 = vst [vmem:[#allocation7 + $0x20] sm:$0xff] %v1599_v45  ;;  %v1602_v24 = vadd.f32 %v1872_v10, %v1601_v31 }
 0x249   :  { %1650 = vst [vmem:[#allocation7 + $0x28] sm:$0xff] %v1602_v24 }
 0x24b   :  { %v2009_v53 = vpop.f32.mrb[56].mxu1 }
 0x24c   :  { %v1873_v49 = vpop.f32.mrb[60].mxu0  ;;  %v1614_v62 = vpop.f32.mrb[57].mxu1 }
 0x24d   :  { %v1874_v15 = vpop.f32.mrb[61].mxu0  ;;  %v2010_v37 = vpop.f32.mrb[58].mxu1 }
 0x24e   :  { %v1875_v41 = vadd.f32 %v1874_v15, %v1873_v49  ;;  %v1876_v11 = vpop.f32.mrb[62].mxu0  ;;  %v1617_v16 = vpop.f32.mrb[59].mxu1 }
 0x24f   :  { %v1877_v51 = vpop.f32.mrb[63].mxu0 }
 0x250   :  { %v1878_v19 = vadd.f32 %v1877_v51, %v1876_v11  ;;  %v1607_v54 = vadd.f32 %v2005_v7, %v1875_v41 }
 0x252   :  { %1651 = vst [vmem:[#allocation7 + $0x30] sm:$0xff] %v1607_v54  ;;  %v1610_v20 = vadd.f32 %v2006_v1, %v1878_v19 }
 0x253   :  { %v2013_v46 = vpop.f32.mrb[60].mxu1 }
 0x254   :  { %v1879_v57 = vpop.f32.mrb[64].mxu0  ;;  %1652 = vst [vmem:[#allocation7 + $0x38] sm:$0xff] %v1610_v20  ;;  %v1630_v13 = vpop.f32.mrb[61].mxu1 }
 0x255   :  { %v1880_v23 = vpop.f32.mrb[65].mxu0  ;;  %v2014_v59 = vpop.f32.mrb[62].mxu1 }
 0x256   :  { %v1881_v63 = vadd.f32 %v1880_v23, %v1879_v57  ;;  %v1882_v9 = vpop.f32.mrb[66].mxu0  ;;  %v1633_v33 = vpop.f32.mrb[63].mxu1 }
 0x257   :  { %v1883_v61 = vpop.f32.mrb[67].mxu0 }
 0x258   :  { %v1884_v25 = vadd.f32 %v1883_v61, %v1882_v9  ;;  %v1615_v4 = vadd.f32 %v1881_v63, %v1614_v62 }
 0x25a   :  { %1653 = vst [vmem:[#allocation7 + $0x40] sm:$0xff] %v1615_v4  ;;  %v1618_v2 = vadd.f32 %v1884_v25, %v1617_v16 }
 0x25c   :  { %1654 = vst [vmem:[#allocation7 + $0x48] sm:$0xff] %v1618_v2 }
 0x261   :  { %v1885_v43 = vpop.f32.mrb[68].mxu0 }
 0x262   :  { %v1886_v17 = vpop.f32.mrb[69].mxu0 }
 0x263   :  { %v1887_v47 = vadd.f32 %v1886_v17, %v1885_v43  ;;  %v1888_v30 = vpop.f32.mrb[70].mxu0 }
 0x264   :  { %v1889_v5 = vpop.f32.mrb[71].mxu0 }
 0x265   :  { %v1890_v40 = vadd.f32 %v1889_v5, %v1888_v30  ;;  %v1623_v12 = vadd.f32 %v2009_v53, %v1887_v47 }
 0x267   :  { %1655 = vst [vmem:[#allocation7 + $0x50] sm:$0xff] %v1623_v12  ;;  %v1626_v3 = vadd.f32 %v2010_v37, %v1890_v40 }
 0x269   :  { %v1891_v55 = vpop.f32.mrb[72].mxu0  ;;  %1656 = vst [vmem:[#allocation7 + $0x58] sm:$0xff] %v1626_v3 }
 0x26a   :  { %v1892_v44 = vpop.f32.mrb[73].mxu0 }
 0x26b   :  { %v1893_v18 = vadd.f32 %v1892_v44, %v1891_v55  ;;  %v1894_v48 = vpop.f32.mrb[74].mxu0 }
 0x26c   :  { %v1895_v56 = vpop.f32.mrb[75].mxu0 }
 0x26d   :  { %v1896_v21 = vadd.f32 %v1895_v56, %v1894_v48  ;;  %v1631_v6 = vadd.f32 %v1893_v18, %v1630_v13 }
 0x26f   :  { %1657 = vst [vmem:[#allocation7 + $0x60] sm:$0xff] %v1631_v6  ;;  %v1634_v38 = vadd.f32 %v1896_v21, %v1633_v33 }
 0x271   :  { %v1897_v29 = vpop.f32.mrb[76].mxu0  ;;  %1658 = vst [vmem:[#allocation7 + $0x68] sm:$0xff] %v1634_v38 }
 0x272   :  { %v1898_v35 = vpop.f32.mrb[77].mxu0 }
 0x273   :  { %v1899_v28 = vadd.f32 %v1898_v35, %v1897_v29  ;;  %v1900_v22 = vpop.f32.mrb[78].mxu0 }
 0x274   :  { %v1901_v26 = vpop.f32.mrb[79].mxu0 }
 0x275   :  { %v1639_v60 = vadd.f32 %v2013_v46, %v1899_v28  ;;  %v1902_v34 = vadd.f32 %v1901_v26, %v1900_v22 }
 0x277   :  { %1659 = vst [vmem:[#allocation7 + $0x70] sm:$0xff] %v1639_v60  ;;  %v1642_v50 = vadd.f32 %v2014_v59, %v1902_v34 }
 0x279   :  { %1660 = vst [vmem:[#allocation7 + $0x78] sm:$0xff] %v1642_v50 }
 0x27a   :  { %2368 = shalt.err (!%p2365_p6)
}
 0x27b   :  { %s2369_s26 = scalar_lea.hbm %s2929_s4, 2048 }
 0x27c   :  { %p2370_p7 = scmp.ne.s32.totalorder %s2929_s4, %s2369_s26  ;;  %p2373_p8 = scmp.lt.u32.totalorder %s2369_s26, %s2929_s4 }
 0x27e   :  { %p2375_p9 = pnand %p2373_p8, %p2370_p7 }
 0x280   :  { %2378 = shalt.err (!%p2375_p9)
}
 0x281   :  { %s2393_s5 = smov 128   ;;  %s2394_s6 = smov 8  }
 0x282   :  { %1672 = dma.vmem_to_hbm [thread:$0]  %s1667_s22, 2048, %s2929_s4, [#allocation4], %s2393_s5, %s2393_s5, %s2394_s6  }
 0x283   :  { %2383 = dma.done.wait [#allocation4], 2048  }
 0x284   :  { %2384 = vsyncadd [#allocation4], 4294965248 }
 0x285   :  { %1676 = vsyncpa [#allocation3], 1 }
 0x286   :  { %1677 = vsyncpa [#allocation6], 1 }
 0x287   :  { %1678 = vsyncpa [#allocation4], 1 }

</bundles_post_ra>
